<compile_context>
chip_gen: v6e
topology: v6e:2x2x1
jax: 0.10.0
libtpu: 0.0.40
codegen_flags: <defaults>
</compile_context>

<pallas_src>
import jax
import jax.numpy as jnp
from jax.experimental import pallas as pl
from jax.experimental.pallas import tpu as pltpu


def _round_up(x, m):
    return (x + m - 1) // m * m


def _proj_logsoftmax_kernel(x_ref, w_ref, b_ref, o_ref, m_ref, l_ref):
    # x_ref: (tm, D) compute dtype    w_ref: (D, tv) compute dtype    b_ref: (1, tv) f32
    # o_ref: (tm, V_pad) out/staging dtype, resident across the vocab grid axis.
    # m_ref / l_ref: (tm, 1) f32 running max / running sum-of-exp.
    v = pl.program_id(1)
    nv = pl.num_programs(1)
    tv = w_ref.shape[1]

    @pl.when(v == 0)
    def _init():
        m_ref[...] = jnp.full_like(m_ref, -jnp.inf)
        l_ref[...] = jnp.zeros_like(l_ref)

    # (tm, tv) logits for this vocab tile: bf16 MXU matmul, f32 accumulation.
    logits = jnp.dot(x_ref[...], w_ref[...], preferred_element_type=jnp.float32)
    logits = logits + b_ref[...]  # bias added before the running-max update (f32)

    # Online log-softmax statistics (all f32).
    m_prev = m_ref[...]
    m_new = jnp.maximum(m_prev, jnp.max(logits, axis=-1, keepdims=True))
    l_ref[...] = (l_ref[...] * jnp.exp(m_prev - m_new)
                  + jnp.sum(jnp.exp(logits - m_new), axis=-1, keepdims=True))
    m_ref[...] = m_new

    # Stage raw logits (bf16 by default) into the resident output block.
    col = pl.multiple_of(v * tv, 128)
    o_ref[:, pl.ds(col, tv)] = logits.astype(o_ref.dtype)

    @pl.when(v == nv - 1)
    def _finalize():
        lse = m_ref[...] + jnp.log(l_ref[...])
        # Subtraction in f32; only the final store rounds back to out_dtype.
        o_ref[...] = (o_ref[...].astype(jnp.float32) - lse).astype(o_ref.dtype)


def projection_layer(x, weight, bias, *, tm=None, tv=512,
                     compute_dtype=jnp.bfloat16, out_dtype=jnp.bfloat16):
    """log_softmax(x @ weight + bias, axis=-1).

    x: (B, S, D); weight: (D, V); bias: (V,).  Returns (B, S, V) in out_dtype.
    Pass weight already in compute_dtype to avoid a per-call full-weight cast.
    """
    B, S, D = x.shape
    Dw, V = weight.shape
    assert D == Dw and bias.shape == (V,)

    cbytes = jnp.dtype(compute_dtype).itemsize
    obytes = jnp.dtype(out_dtype).itemsize

    # Vocab tile: multiple of 256 (full MXU output width on v6e/v7x), lane-dense.
    tv_eff = max(256, _round_up(tv, 256))
    v128 = _round_up(V, 128)
    if tv_eff >= v128:
        tv_eff = v128                      # small vocab: single lane-dense tile
    V_pad = _round_up(V, tv_eff)

    # Physical VMEM capacity (fallback: conservative 64 MiB).
    try:
        vmem_cap = int(pltpu.get_tpu_info().vmem_capacity_bytes)
    except Exception:
        vmem_cap = 64 * 1024 * 1024

    M = B * S
    tm_max = _round_up(M, 8)

    def vmem_budget(tm_c):
        return (2 * tm_c * D * cbytes          # x tiles (double-buffered)
                + 2 * D * tv_eff * cbytes      # streamed weight tiles
                + 2 * tv_eff * 4               # streamed bias tiles
                + 2 * tm_c * V_pad * obytes    # resident output/staging block
                + 2 * tm_c * 128 * 4)          # (tm,1) f32 scratch (lane-padded)

    if tm is None:
        # Largest row tile that keeps ~25% VMEM headroom (per-generation sizing
        # falls out of the capacity query: v6e -> 512-1024, v7x -> 256-512).
        tm = 128
        for cand in (1024, 768, 512, 384, 256, 192, 128):
            c = min(cand, tm_max)
            if vmem_budget(c) <= int(vmem_cap * 0.75):
                tm = c
                break
    tm_eff = max(8, min(_round_up(tm, 8), tm_max))
    M_pad = _round_up(M, tm_eff)

    # Activations: reshape, cast, pad rows (padded rows are finite and sliced off).
    x2d = x.reshape(M, D).astype(compute_dtype)
    if M_pad != M:
        x2d = jnp.pad(x2d, ((0, M_pad - M), (0, 0)))

    # Weight: cast only if needed (avoid a per-call (D, V) HBM cast when possible).
    w = weight if weight.dtype == jnp.dtype(compute_dtype) else weight.astype(compute_dtype)
    b = bias.astype(jnp.float32)
    if V_pad != V:
        w = jnp.pad(w, ((0, 0), (0, V_pad - V)))
        # Pad bias columns with a large negative value -> exp() underflows to 0,
        # so padded columns never perturb the softmax statistics.
        b = jnp.pad(b, (0, V_pad - V), constant_values=-1e9)
    b2d = b.reshape(1, V_pad)

    grid = (M_pad // tm_eff, V_pad // tv_eff)
    n_row_tiles = grid[0]

    budget = vmem_budget(tm_eff)
    vmem_limit = int(min(int(vmem_cap * 0.9),
                         max(32 * 1024 * 1024, budget + 4 * 1024 * 1024)))

    cost = pl.CostEstimate(
        flops=2 * M_pad * D * V_pad,
        transcendentals=M_pad * V_pad,
        bytes_accessed=(M_pad * D * cbytes                         # x
                        + n_row_tiles * D * V_pad * cbytes         # streamed weight
                        + n_row_tiles * V_pad * 4                  # streamed bias
                        + M_pad * V_pad * obytes),                 # output
    )

    out = pl.pallas_call(
        _proj_logsoftmax_kernel,
        out_shape=jax.ShapeDtypeStruct((M_pad, V_pad), out_dtype),
        grid_spec=pltpu.PrefetchScalarGridSpec(
            num_scalar_prefetch=0,
            grid=grid,
            in_specs=[
                pl.BlockSpec((tm_eff, D), lambda i, v: (i, 0)),    # row tile of activations
                pl.BlockSpec((D, tv_eff), lambda i, v: (0, v)),    # streamed weight tile
                pl.BlockSpec((1, tv_eff), lambda i, v: (0, v)),    # streamed bias tile
            ],
            out_specs=pl.BlockSpec((tm_eff, V_pad), lambda i, v: (i, 0)),  # resident over v
            scratch_shapes=[
                pltpu.VMEM((tm_eff, 1), jnp.float32),   # running max
                pltpu.VMEM((tm_eff, 1), jnp.float32),   # running sum of exp
            ],
        ),
        compiler_params=pltpu.CompilerParams(
            dimension_semantics=("parallel", "arbitrary"),
            vmem_limit_bytes=vmem_limit,
        ),
        cost_estimate=cost,
    )(x2d, w, b2d)

    return out[:M, :V].reshape(B, S, V)


def _reference(x, weight, bias, compute_dtype=jnp.float32):
    logits = jnp.einsum("bsd,dv->bsv",
                        x.astype(compute_dtype), weight.astype(compute_dtype),
                        preferred_element_type=jnp.float32)
    logits = logits + bias.astype(jnp.float32)
    return jax.nn.log_softmax(logits, axis=-1)


if __name__ == "__main__":
    # Small shapes consistent with the module: batch=2, seq=128, embedding_dim=32, vocab=512.
    B, S, D, V = 2, 128, 32, 512
    key = jax.random.PRNGKey(0)
    kx, kw, kb, kx2, kw3, kb3 = jax.random.split(key, 6)

    # Deterministic params mimicking nn.Linear's uniform(-1/sqrt(D), 1/sqrt(D)).
    bound = 1.0 / (D ** 0.5)
    weight = jax.random.uniform(kw, (D, V), jnp.float32, minval=-bound, maxval=bound)
    bias = jax.random.uniform(kb, (V,), jnp.float32, minval=-bound, maxval=bound)
    x = jax.random.normal(kx, (B, S, D), jnp.float32)

    # Pre-cast the weight once (parameter-level bf16), as the review recommends.
    weight_bf16 = weight.astype(jnp.bfloat16)

    # Test 1: explicit 2x2 (row-tile, vocab-tile) grid; bf16 staging + online log-softmax.
    out = projection_layer(x, weight_bf16, bias, tm=128, tv=256)
    jax.block_until_ready(out)
    assert out.shape == (B, S, V)
    out_f32 = out.astype(jnp.float32)
    assert bool(jnp.all(jnp.isfinite(out_f32)))
    # Probabilities must sum to ~1 per row (log-softmax invariant).
    psum = jnp.exp(out_f32).sum(axis=-1)
    assert jnp.allclose(psum, jnp.ones_like(psum), atol=2e-2), "prob rows do not sum to 1"
    # Matched-precision reference (bf16 matmul inputs, f32 accumulation).
    ref_matched = _reference(x, weight, bias, compute_dtype=jnp.bfloat16)
    assert jnp.allclose(out_f32, ref_matched, atol=6e-2, rtol=3e-2), "mismatch vs bf16-matched reference"
    # Module-semantics (full f32) reference, loose tolerance for bf16 path.
    ref_f32 = _reference(x, weight, bias, compute_dtype=jnp.float32)
    assert jnp.allclose(out_f32, ref_f32, atol=1e-1, rtol=5e-2), "mismatch vs f32 reference"

    # Test 2: ragged row count, auto tm/tv (exercises pad-M / slice-back + auto sizing).
    x2 = jax.random.normal(kx2, (B, 10, D), jnp.float32)
    out2 = projection_layer(x2, weight_bf16, bias)
    jax.block_until_ready(out2)
    assert out2.shape == (B, 10, V)
    ref2 = _reference(x2, weight, bias, compute_dtype=jnp.bfloat16)
    assert jnp.allclose(out2.astype(jnp.float32), ref2, atol=6e-2, rtol=3e-2), \
        "mismatch vs reference (padded rows)"

    # Test 3: vocab not a multiple of 128 (exercises the pad-V path, replaces old fallback).
    V3 = 200
    weight3 = jax.random.uniform(kw3, (D, V3), jnp.float32, minval=-bound, maxval=bound)
    bias3 = jax.random.uniform(kb3, (V3,), jnp.float32, minval=-bound, maxval=bound)
    out3 = projection_layer(x, weight3.astype(jnp.bfloat16), bias3)
    jax.block_until_ready(out3)
    assert out3.shape == (B, S, V3)
    ref3 = _reference(x, weight3, bias3, compute_dtype=jnp.bfloat16)
    assert jnp.allclose(out3.astype(jnp.float32), ref3, atol=6e-2, rtol=3e-2), \
        "mismatch vs reference (padded vocab)"

    print("KERNEL_OK")
</pallas_src>

<mosaic_0001>
module attributes {stable_mosaic.version = 11 : i64} {
  func.func @_proj_logsoftmax_kernel(%arg0: i32, %arg1: i32, %arg2: memref<128x32xbf16, #tpu.memory_space<vmem>>, %arg3: memref<32x256xbf16, #tpu.memory_space<vmem>>, %arg4: memref<1x256xf32, #tpu.memory_space<vmem>>, %arg5: memref<128x512xbf16, #tpu.memory_space<vmem>>, %arg6: memref<128x1xf32, #tpu.memory_space<vmem>>, %arg7: memref<128x1xf32, #tpu.memory_space<vmem>>) attributes {dimension_semantics = [#tpu.dimension_semantics<parallel>, #tpu.dimension_semantics<arbitrary>], iteration_bounds = array<i64: 2, 2>, scalar_prefetch = 0 : i64, scratch_operands = 2 : i64, tpu.core_type = #tpu.core_type<tc>, window_params = [{transform_indices = @transform_0, window_bounds = array<i64: 128, 32>}, {transform_indices = @transform_1, window_bounds = array<i64: 32, 256>}, {transform_indices = @transform_2, window_bounds = array<i64: 1, 256>}, {transform_indices = @transform_3, window_bounds = array<i64: 128, 512>}]} {
    %c0_i32 = arith.constant 0 : i32
    %0 = arith.cmpi eq, %arg1, %c0_i32 : i32
    %1 = arith.extui %0 : i1 to i32
    %c0_i32_0 = arith.constant 0 : i32
    %2 = arith.cmpi ne, %1, %c0_i32_0 : i32
    scf.if %2 {
      %cst_18 = arith.constant 0xFF800000 : f32
      %33 = vector.broadcast %cst_18 : f32 to vector<128x1xf32>
      %c0_19 = arith.constant 0 : index
      %c0_20 = arith.constant 0 : index
      %34 = vector.load %arg6[%c0_19, %c0_20] : memref<128x1xf32, #tpu.memory_space<vmem>>, vector<128x1xf32>
      tpu.vector_store %arg6[%c0_19, %c0_20], %33 {strides = array<i32>} : memref<128x1xf32, #tpu.memory_space<vmem>>, vector<128x1xf32>,
      %cst_21 = arith.constant 0.000000e+00 : f32
      %35 = vector.broadcast %cst_21 : f32 to vector<128x1xf32>
      %c0_22 = arith.constant 0 : index
      %c0_23 = arith.constant 0 : index
      %36 = vector.load %arg7[%c0_22, %c0_23] : memref<128x1xf32, #tpu.memory_space<vmem>>, vector<128x1xf32>
      tpu.vector_store %arg7[%c0_22, %c0_23], %35 {strides = array<i32>} : memref<128x1xf32, #tpu.memory_space<vmem>>, vector<128x1xf32>,
    } else {
    }
    %c0 = arith.constant 0 : index
    %c0_1 = arith.constant 0 : index
    %3 = vector.load %arg2[%c0, %c0_1] : memref<128x32xbf16, #tpu.memory_space<vmem>>, vector<128x32xbf16>
    %c0_2 = arith.constant 0 : index
    %c0_3 = arith.constant 0 : index
    %4 = vector.load %arg3[%c0_2, %c0_3] : memref<32x256xbf16, #tpu.memory_space<vmem>>, vector<32x256xbf16>
    %cst = arith.constant dense<0.000000e+00> : vector<128x256xf32>
    %5 = tpu.matmul %3, %4, %cst {dimension_numbers = #tpu.dot_dimension_numbers<[1], [0], [0], [1], [0, 0, 1, 1], [], []>} : vector<128x32xbf16>, vector<32x256xbf16>, vector<128x256xf32> -> vector<128x256xf32>
    %c0_4 = arith.constant 0 : index
    %c0_5 = arith.constant 0 : index
    %6 = vector.load %arg4[%c0_4, %c0_5] : memref<1x256xf32, #tpu.memory_space<vmem>>, vector<1x256xf32>
    %7 = vector.broadcast %6 : vector<1x256xf32> to vector<128x256xf32>
    %8 = arith.addf %5, %7 : vector<128x256xf32>
    %c0_6 = arith.constant 0 : index
    %c0_7 = arith.constant 0 : index
    %9 = vector.load %arg6[%c0_6, %c0_7] : memref<128x1xf32, #tpu.memory_space<vmem>>, vector<128x1xf32>
    %cst_8 = arith.constant dense<0xFF800000> : vector<128xf32>
    %10 = vector.multi_reduction <maximumf>, %8, %cst_8 [1] : vector<128x256xf32> to vector<128xf32>
    %11 = vector.shape_cast %10 : vector<128xf32> to vector<128x1xf32>
    %12 = arith.maximumf %9, %11 : vector<128x1xf32>
    %c0_9 = arith.constant 0 : index
    %c0_10 = arith.constant 0 : index
    %13 = vector.load %arg7[%c0_9, %c0_10] : memref<128x1xf32, #tpu.memory_space<vmem>>, vector<128x1xf32>
    %14 = arith.subf %9, %12 : vector<128x1xf32>
    %15 = math.exp %14 : vector<128x1xf32>
    %16 = arith.mulf %13, %15 : vector<128x1xf32>
    %17 = vector.broadcast %12 : vector<128x1xf32> to vector<128x256xf32>
    %18 = arith.subf %8, %17 : vector<128x256xf32>
    %19 = math.exp %18 : vector<128x256xf32>
    %cst_11 = arith.constant dense<0.000000e+00> : vector<128xf32>
    %20 = vector.multi_reduction <add>, %19, %cst_11 [1] : vector<128x256xf32> to vector<128xf32>
    %21 = vector.shape_cast %20 : vector<128xf32> to vector<128x1xf32>
    %22 = arith.addf %16, %21 : vector<128x1xf32>
    %c0_12 = arith.constant 0 : index
    %c0_13 = arith.constant 0 : index
    %23 = vector.load %arg7[%c0_12, %c0_13] : memref<128x1xf32, #tpu.memory_space<vmem>>, vector<128x1xf32>
    tpu.vector_store %arg7[%c0_12, %c0_13], %22 {strides = array<i32>} : memref<128x1xf32, #tpu.memory_space<vmem>>, vector<128x1xf32>,
    %c0_14 = arith.constant 0 : index
    %c0_15 = arith.constant 0 : index
    %24 = vector.load %arg6[%c0_14, %c0_15] : memref<128x1xf32, #tpu.memory_space<vmem>>, vector<128x1xf32>
    tpu.vector_store %arg6[%c0_14, %c0_15], %12 {strides = array<i32>} : memref<128x1xf32, #tpu.memory_space<vmem>>, vector<128x1xf32>,
    %c256_i32 = arith.constant 256 : i32
    %25 = arith.muli %arg1, %c256_i32 : i32
    %26 = tpu.assume_multiple %25, 128 : i32
    %27 = arith.truncf %8 : vector<128x256xf32> to vector<128x256xbf16>
    %c0_16 = arith.constant 0 : index
    %28 = arith.index_cast %26 : i32 to index
    %29 = vector.load %arg5[%c0_16, %28] : memref<128x512xbf16, #tpu.memory_space<vmem>>, vector<128x256xbf16>
    tpu.vector_store %arg5[%c0_16, %28], %27 {strides = array<i32>} : memref<128x512xbf16, #tpu.memory_space<vmem>>, vector<128x256xbf16>,
    %c1_i32 = arith.constant 1 : i32
    %30 = arith.cmpi eq, %arg1, %c1_i32 : i32
    %31 = arith.extui %30 : i1 to i32
    %c0_i32_17 = arith.constant 0 : i32
    %32 = arith.cmpi ne, %31, %c0_i32_17 : i32
    scf.if %32 {
      %c0_18 = arith.constant 0 : index
      %c0_19 = arith.constant 0 : index
      %33 = vector.load %arg6[%c0_18, %c0_19] : memref<128x1xf32, #tpu.memory_space<vmem>>, vector<128x1xf32>
      %c0_20 = arith.constant 0 : index
      %c0_21 = arith.constant 0 : index
      %34 = vector.load %arg7[%c0_20, %c0_21] : memref<128x1xf32, #tpu.memory_space<vmem>>, vector<128x1xf32>
      %35 = math.log %34 : vector<128x1xf32>
      %36 = arith.addf %33, %35 : vector<128x1xf32>
      %c0_22 = arith.constant 0 : index
      %c0_23 = arith.constant 0 : index
      %37 = vector.load %arg5[%c0_22, %c0_23] : memref<128x512xbf16, #tpu.memory_space<vmem>>, vector<128x512xbf16>
      %38 = arith.extf %37 : vector<128x512xbf16> to vector<128x512xf32>
      %39 = vector.broadcast %36 : vector<128x1xf32> to vector<128x512xf32>
      %40 = arith.subf %38, %39 : vector<128x512xf32>
      %41 = arith.truncf %40 : vector<128x512xf32> to vector<128x512xbf16>
      %c0_24 = arith.constant 0 : index
      %c0_25 = arith.constant 0 : index
      %42 = vector.load %arg5[%c0_24, %c0_25] : memref<128x512xbf16, #tpu.memory_space<vmem>>, vector<128x512xbf16>
      tpu.vector_store %arg5[%c0_24, %c0_25], %41 {strides = array<i32>} : memref<128x512xbf16, #tpu.memory_space<vmem>>, vector<128x512xbf16>,
    } else {
    }
    return
  }
  func.func @transform_0(%arg0: i32, %arg1: i32) -> (i32, i32) {
    %c0_i32 = arith.constant 0 : i32
    %c0_i32_0 = arith.constant 0 : i32
    return %arg0, %c0_i32 : i32, i32
  }
  func.func @transform_1(%arg0: i32, %arg1: i32) -> (i32, i32) {
    %c0_i32 = arith.constant 0 : i32
    %c0_i32_0 = arith.constant 0 : i32
    return %c0_i32, %arg1 : i32, i32
  }
  func.func @transform_2(%arg0: i32, %arg1: i32) -> (i32, i32) {
    %c0_i32 = arith.constant 0 : i32
    %c0_i32_0 = arith.constant 0 : i32
    return %c0_i32, %arg1 : i32, i32
  }
  func.func @transform_3(%arg0: i32, %arg1: i32) -> (i32, i32) {
    %c0_i32 = arith.constant 0 : i32
    %c0_i32_0 = arith.constant 0 : i32
    return %arg0, %c0_i32 : i32, i32
  }
}

</mosaic_0001>

<bundles_post_ra>
// kernel: tpu_custom_call.1
= control target key start
LH: loop header
LB: loop body
LE: loop exit
PB: predicated region body
PF: predicated region fallthrough
CT: control target
= control target key end

     0   :  { %s3241_s0 = inlined_call_operand.vmem [shape: bf16[256,32], index: 0, kind: input, shape index: {}]   ;;  %s3242_s1 = inlined_call_operand.vmem [shape: bf16[32,512], index: 1, kind: input, shape index: {}]   ;;  %s3243_s2 = inlined_call_operand.vmem [shape: f32[1,512], index: 2, kind: input, shape index: {}]   ;;  %s3244_s3 = inlined_call_operand.hbm [shape: bf16[256,512], index: 3, kind: output, shape index: {}]  }
   0x1   :  { %3261 = sst [smem:[#allocation23_spill]] %s3242_s1 }
   0x2   :  { %8 = vsyncpa [#allocation6], 0 }
   0x3   :  { %10 = vsyncpa [#allocation6 + $0x1], 0  ;;  %s2277_s12 = smov 0   ;;  %s2279_s13 = smov 0  }
   0x4   :  { %s2281_s14 = smov 0   ;;  %s2283_s15 = smov 0  }
   0x5   :  { %s2285_s16 = smov 0   ;;  %s2287_s17 = smov 0  }
   0x6   :  { %s2289_s18 = smov 0   ;;  %s2291_s19 = smov 0  }
   0x7   :  { %s2293_s20 = smov 0   ;;  %s2295_s21 = smov 0  }
   0x8 LB: > { %s1755_s22 = sadd.s32 4294967295, %s2248_s21   ;;  %s1756_s23 = sadd.s32 4294967294, %s2248_s21   ;;  %s2248_s21 = sphi %s2295_s21, %s16_s21   ;;  %s2244_s20 = sphi %s2293_s20, %s3329_s20   ;;  %s2240_s19 = sphi %s2291_s19, %s3328_s19   ;;  %s2236_s18 = sphi %s2289_s18, %s3327_s18   ;;  %s2232_s17 = sphi %s2287_s17, %s3326_s17   ;;  %s2228_s16 = sphi %s2285_s16, %s3325_s16   ;;  %s2224_s15 = sphi %s2283_s15, %s3324_s15   ;;  %s2220_s14 = sphi %s2281_s14, %s3323_s14   ;;  %s2216_s13 = sphi %s2279_s13, %s3322_s13   ;;  %s2212_s12 = sphi %s2277_s12, %s3321_s12  }
   0x9   : > { %s25_s24 = sadd.s32 1, %s2240_s19  ;;  %s28_s25 = sadd.s32 1, %s2244_s20 }
   0xa   : > { %p26_p0 = scmp.ge.s32.totalorder %s25_s24, 2  ;;  %s61_s26 = sadd.s32 1, %s2228_s16 }
   0xb   : > { %p68_p1 = scmp.ne.s32.totalorder %s2228_s16, %s2224_s15  ;;  %p69_p2 = scmp.eq.s32.totalorder %s2248_s21, 0 }
   0xc   : > { %s3331_s24 = smov (%p26_p0, %s25_s24), 0  ;;  %s3333_s25 = smov (!%p26_p0, %s28_s25), %s2244_s20 }
   0xd   : > { %s58_s27 = ssub.s32 %s2240_s19, %s3331_s24  ;;  %p2340_p3 = por %p69_p2, %p68_p1 }
   0xe   : > { %p30_p4 = scmp.ge.s32.totalorder %s3333_s25, 2  ;;  %p59_p5 = scmp.eq.s32.totalorder %s58_s27, 0 }
   0xf   : > { %s113_s29 = sadd.s32 1, %s2220_s14  ;;  %p123_p6 = scmp.ne.s32.totalorder %s2220_s14, %s2216_s13 }
  0x10   : > { %s3335_s25 = smov (%p30_p4, %s3333_s25), 0  ;;  %p124_p7 = scmp.eq.s32.totalorder %s1755_s22, 3 }
  0x11   : > { %s2350_s30 = scalar_select %p59_p5, %s2228_s16, %s61_s26  }
  0x12   : > { %s110_s4 = ssub.s32 %s2244_s20, %s3335_s25  ;;  %p129_p9 = scmp.ne.s32.totalorder %s2216_s13, %s2212_s12 }
  0x13   : > { %p111_p8 = scmp.eq.s32.totalorder %s110_s4, 0  ;;  %p2356_p10 = por %p124_p7, %p123_p6 }
  0x14   : > { %p130_p11 = scmp.eq.s32.totalorder %s1756_s23, 3  ;;  %p1758_p13 = scmp.ge.s32.totalorder %s2248_s21, 4 }
  0x15   : > { %s2361_s6 = scalar_select %p111_p8, %s2220_s14, %s113_s29  }
  0x16   : > { %p2363_p12 = por %p130_p11, %p129_p9  ;;  %146 = sbr.rel (%p1758_p13) target bundleno = 39 (0x27), region = 16 }
  0x1b   : > { %158 = sbr.rel (!%p2340_p3) target bundleno = 39 (0x27), region = 24  ;;  %s160_s8 = sand.u32 (%p2340_p3), 1, %s2228_s16  }
  0x1c   : > { %s1846_s9 = sshll.u32 (%p2340_p3), %s2240_s19, 3  ;;  %s1759_s10 = sshll.u32 (%p2340_p3), %s160_s8, 5 }
  0x1d   : > { %s3265_s1 = sld [smem:[#allocation23_spill]] (%p2340_p3)  ;;  %s162_s26 = scalar_lea.vmem (%p2340_p3), [#allocation4], %s1759_s10 }
  0x23   : > { %s165_s23 = scalar_lea.vmem %s3265_s1, %s1846_s9 }
  0x24   : > { %v200_v0 = vld [vmem:[%s165_s23] sm:$0xff]  ;;  %v202_v1 = vld [vmem:[%s165_s23 + $0x10] sm:$0xff] }
  0x25   : > { %v204_v2 = vld [vmem:[%s165_s23 + $0x20] sm:$0xff]  ;;  %201 = vst [vmem:[%s162_s26] sm:$0xff] %v200_v0  ;;  %203 = vst [vmem:[%s162_s26 + $0x8] sm:$0xff] %v202_v1  ;;  %v206_v3 = vld [vmem:[%s165_s23 + $0x30] sm:$0xff] }
  0x26   : > { %205 = vst [vmem:[%s162_s26 + $0x10] sm:$0xff] %v204_v2  ;;  %207 = vst [vmem:[%s162_s26 + $0x18] sm:$0xff] %v206_v3 }
  0x27 PF: > { %p1762_p0 = scmp.ge.s32.totalorder %s2248_s21, 1  ;;  %p220_p1 = scmp.lt.s32.totalorder %s2248_s21, 5 }
  0x29   : > { %p221_p2 = pnand %p1762_p0, %p220_p1 }
  0x2b   : > { %224 = sbr.rel (%p221_p2) target bundleno = 961 (0x3c1), region = 66 }
  0x30   : > { %s227_s27 = sand.u32 1, %s2224_s15   ;;  %s3245_s28 = sand.u32 1, %s2216_s13  }
  0x31   : > { %s1763_s29 = sshll.u32 %s227_s27, 5  ;;  %s1764_s4 = sshll.u32 %s3245_s28, 8 }
  0x32   : > { %s1765_s8 = sshll.u32 %s2236_s18, 4  ;;  %s1767_s9 = sshll.u32 %s2232_s17, 1 }
  0x33   : > { %p260_p3 = scmp.lt.s32.totalorder %s1765_s8, 31  ;;  %p267_p4 = scmp.lt.s32.totalorder %s1767_s9, 3 }
  0x34   : > { %s2394_s1 = scalar_lea.vmem [#allocation4], %s1763_s29  ;;  %s2396_s28 = scalar_lea.vmem [#allocation5], %s1764_s4 }
  0x35   : > { %s3337_s8 = smov (!%p260_p3, %s1765_s8), 31  ;;  %s3339_s9 = smov (!%p267_p4, %s1767_s9), 3 }
  0x36   : > { %s1766_s10 = sshll.u32 %s3337_s8, 2  ;;  %s269_s27 = scalar_lea.vmem %s3243_s2, %s3339_s9 }
  0x37   : > { %s2388_s23 = scalar_lea.vmem %s3241_s0, %s1766_s10  ;;  %p1768_p5 = scmp.ne.s32.totalorder %s2232_s17, 0 }
  0x39   : > { %276 = sbr.rel (%p1768_p5) target bundleno = 79 (0x4f), region = 74 }
  0x3e   : > { %vm277_vm0 = vcmask 7168   ;;  %v2250_v4 = vmov -inf   ;;  %v2251_v5 = vmov 0.0  }
  0x3f   : > { %278 = vst.msk [vmem:[#allocation2] sm:$0xff] %vm277_vm0, %v2250_v4  ;;  %279 = vst.msk [vmem:[#allocation2 + $0x8] sm:$0xff] %vm277_vm0, %v2250_v4 }
  0x40   : > { %280 = vst.msk [vmem:[#allocation2 + $0x10] sm:$0xff] %vm277_vm0, %v2250_v4  ;;  %281 = vst.msk [vmem:[#allocation2 + $0x18] sm:$0xff] %vm277_vm0, %v2250_v4 }
  0x41   : > { %282 = vst.msk [vmem:[#allocation2 + $0x20] sm:$0xff] %vm277_vm0, %v2250_v4  ;;  %283 = vst.msk [vmem:[#allocation2 + $0x28] sm:$0xff] %vm277_vm0, %v2250_v4 }
  0x42   : > { %284 = vst.msk [vmem:[#allocation2 + $0x30] sm:$0xff] %vm277_vm0, %v2250_v4  ;;  %285 = vst.msk [vmem:[#allocation2 + $0x38] sm:$0xff] %vm277_vm0, %v2250_v4 }
  0x43   : > { %286 = vst.msk [vmem:[#allocation2 + $0x40] sm:$0xff] %vm277_vm0, %v2250_v4  ;;  %287 = vst.msk [vmem:[#allocation2 + $0x48] sm:$0xff] %vm277_vm0, %v2250_v4 }
  0x44   : > { %288 = vst.msk [vmem:[#allocation2 + $0x50] sm:$0xff] %vm277_vm0, %v2250_v4  ;;  %289 = vst.msk [vmem:[#allocation2 + $0x58] sm:$0xff] %vm277_vm0, %v2250_v4 }
  0x45   : > { %290 = vst.msk [vmem:[#allocation2 + $0x60] sm:$0xff] %vm277_vm0, %v2250_v4  ;;  %291 = vst.msk [vmem:[#allocation2 + $0x68] sm:$0xff] %vm277_vm0, %v2250_v4 }
  0x46   : > { %292 = vst.msk [vmem:[#allocation2 + $0x70] sm:$0xff] %vm277_vm0, %v2250_v4  ;;  %293 = vst.msk [vmem:[#allocation2 + $0x78] sm:$0xff] %vm277_vm0, %v2250_v4 }
  0x47   : > { %294 = vst.msk [vmem:[#allocation3] sm:$0xff] %vm277_vm0, %v2251_v5  ;;  %295 = vst.msk [vmem:[#allocation3 + $0x8] sm:$0xff] %vm277_vm0, %v2251_v5 }
  0x48   : > { %296 = vst.msk [vmem:[#allocation3 + $0x10] sm:$0xff] %vm277_vm0, %v2251_v5  ;;  %297 = vst.msk [vmem:[#allocation3 + $0x18] sm:$0xff] %vm277_vm0, %v2251_v5 }
  0x49   : > { %298 = vst.msk [vmem:[#allocation3 + $0x20] sm:$0xff] %vm277_vm0, %v2251_v5  ;;  %299 = vst.msk [vmem:[#allocation3 + $0x28] sm:$0xff] %vm277_vm0, %v2251_v5 }
  0x4a   : > { %300 = vst.msk [vmem:[#allocation3 + $0x30] sm:$0xff] %vm277_vm0, %v2251_v5  ;;  %301 = vst.msk [vmem:[#allocation3 + $0x38] sm:$0xff] %vm277_vm0, %v2251_v5 }
  0x4b   : > { %302 = vst.msk [vmem:[#allocation3 + $0x40] sm:$0xff] %vm277_vm0, %v2251_v5  ;;  %303 = vst.msk [vmem:[#allocation3 + $0x48] sm:$0xff] %vm277_vm0, %v2251_v5 }
  0x4c   : > { %304 = vst.msk [vmem:[#allocation3 + $0x50] sm:$0xff] %vm277_vm0, %v2251_v5  ;;  %305 = vst.msk [vmem:[#allocation3 + $0x58] sm:$0xff] %vm277_vm0, %v2251_v5 }
  0x4d   : > { %306 = vst.msk [vmem:[#allocation3 + $0x60] sm:$0xff] %vm277_vm0, %v2251_v5  ;;  %307 = vst.msk [vmem:[#allocation3 + $0x68] sm:$0xff] %vm277_vm0, %v2251_v5 }
  0x4e   : > { %308 = vst.msk [vmem:[#allocation3 + $0x70] sm:$0xff] %vm277_vm0, %v2251_v5  ;;  %309 = vst.msk [vmem:[#allocation3 + $0x78] sm:$0xff] %vm277_vm0, %v2251_v5 }
  0x4f PF: > { %v1996_v6 = vld [vmem:[%s2394_s1 + $0x14] ss:$8 sps:$4 sm:$0xff]   ;;  %v1998_v7 = vld [vmem:[%s2394_s1 + $0x10] ss:$8 sps:$4 sm:$0xff]   ;;  %v2252_v8 = vmov 0   ;;  %v2002_v11 = vld [vmem:[%s2388_s23] sm:$0xff]   ;;  %v332_v19 = vlaneseq }
  0x50   : > { %459 = vmatprep.mubr.bf16.mxu0 %v2252_v8  ;;  %499 = vmatprep.mubr.bf16.mxu1 %v2252_v8  ;;  %v1999_v9 = vld [vmem:[%s2394_s1 + $0x4] ss:$8 sps:$4 sm:$0xff]   ;;  %v2001_v10 = vld [vmem:[%s2394_s1] ss:$8 sps:$4 sm:$0xff]   ;;  %vm402_vm1 = vcmask 261120   ;;  %v2006_v15 = vld [vmem:[%s2388_s23 + $0x10] sm:$0xff]  }
  0x51   : > { %439 = vmatprep.subr.bf16.mxu0 %v1996_v6  ;;  %1897 = vmatprep.subr.bf16.mxu1 %v1996_v6  ;;  %v2003_v12 = vld [vmem:[%s2388_s23 + $0x20] sm:$0xff]   ;;  %v2004_v13 = vld [vmem:[%s2388_s23 + $0x8] sm:$0xff]   ;;  %v2007_v16 = vld [vmem:[%s2388_s23 + $0x30] sm:$0xff]   ;;  %v333_v20 = vshrl.u32 %v332_v19, 7  ;;  %s1789_s1 = sshll.u32 %s2232_s17, 8  ;;  %vm940_vm2 = vcmask 7168  }
  0x52   : > { %440 = vmatpush1.bf16.msra.mxu0 %v1998_v7  ;;  %1899 = vmatpush1.bf16.msra.mxu1 %v1998_v7  ;;  %v2005_v14 = vld [vmem:[%s2388_s23 + $0x28] sm:$0xff]   ;;  %v2008_v17 = vld [vmem:[%s2388_s23 + $0x18] sm:$0xff]   ;;  %v330_v23 = vld [vmem:[%s269_s27] sm:$0x3]  ;;  %s1070_s8 = sshra.s32 %s1789_s1, 7  ;;  %p1807_p6 = scmp.ne.s32.totalorder %s2232_s17, 1 }
  0x53   : > { %441 = vmatprep.subr.bf16.mxu0 %v1999_v9  ;;  %1898 = vmatprep.subr.bf16.mxu1 %v1999_v9  ;;  %v2009_v18 = vld [vmem:[%s2388_s23 + $0x38] sm:$0xff]   ;;  %v334_v21 = vsub.s32 0, %v333_v20  ;;  %v338_v22 = vsub.s32 1, %v333_v20  ;;  %s1806_s10 = sshll.u32 %s1070_s8, 2 }
  0x54   : > { %1994 = vset.pattern.permute.xlu0 %v2252_v8  ;;  %1995 = vset.pattern.permute.xlu1 %v2252_v8  ;;  %s2474_s9 = scalar_lea.vmem %s2396_s28, %s1806_s10 [#allocation5] }
  0x55   : > { %v2457_v24 = vrot.slane %v330_v23, %v334_v21  ;;  %v2459_v25 = vrot.slane %v330_v23, %v338_v22 }
  0x56   : > { %442 = vmatpush1.bf16.msra.mxu0 %v2001_v10  ;;  %1900 = vmatpush1.bf16.msra.mxu1 %v2001_v10 }
  0x59   : > { %1781 = vmatmul.mubr.msk.bf16.vlgmr.msra.gmra.mxu0 %vm402_vm1, %v2002_v11  ;;  %1785 = vmatmul.mubr.msk.bf16.vlgmr.msra.gmra.mxu1 %vm402_vm1, %v2003_v12 }
  0x5a   : > { %469 = vmatprep.mubr.bf16.mxu0 %v2252_v8  ;;  %509 = vmatprep.mubr.bf16.mxu1 %v2252_v8 }
  0x61   : > { %1782 = vmatmul.mubr.msk.bf16.gmra.mxu0 %vm402_vm1, %v2004_v13  ;;  %1786 = vmatmul.mubr.msk.bf16.gmra.mxu1 %vm402_vm1, %v2005_v14 }
  0x62   : > { %479 = vmatprep.mubr.bf16.mxu0 %v2252_v8  ;;  %519 = vmatprep.mubr.bf16.mxu1 %v2252_v8 }
  0x69   : > { %1783 = vmatmul.mubr.msk.bf16.gmra.mxu0 %vm402_vm1, %v2006_v15  ;;  %1787 = vmatmul.mubr.msk.bf16.gmra.mxu1 %vm402_vm1, %v2007_v16 }
  0x6a   : > { %489 = vmatprep.mubr.bf16.mxu0 %v2252_v8  ;;  %529 = vmatprep.mubr.bf16.mxu1 %v2252_v8 }
  0x71   : > { %1784 = vmatmul.mubr.msk.bf16.gmra.mxu0 %vm402_vm1, %v2008_v17  ;;  %1788 = vmatmul.mubr.msk.bf16.gmra.mxu1 %vm402_vm1, %v2009_v18 }
 0x119   : > { %v461_v26 = vpop.f32.mrf.mxu0  ;;  %v501_v27 = vpop.f32.mrf.mxu1 }
 0x11a   : > { %v2462_v28 = vadd.f32 %v501_v27, %v2457_v24  ;;  %v2465_v31 = vadd.f32 %v461_v26, %v2457_v24 }
 0x11b   : > { %v463_v29 = vpop.f32.mrf.mxu0  ;;  %v503_v30 = vpop.f32.mrf.mxu1 }
 0x11c   : > { %v2468_v32 = vadd.f32 %v463_v29, %v2459_v25  ;;  %v2471_v33 = vadd.f32 %v503_v30, %v2459_v25 }
 0x11d   : > { %v465_v34 = vpop.f32.mrf.mxu0  ;;  %v505_v35 = vpop.f32.mrf.mxu1 }
 0x11e   : > { %v1847_v36 = vpack.c.bf16 %v2468_v32, %v2465_v31  ;;  %v1855_v37 = vpack.c.bf16 %v2471_v33, %v2462_v28  ;;  %v556_v40 = vmax.f32 %v2465_v31, %v2468_v32  ;;  %v2485_v41 = vadd.f32 %v465_v34, %v2457_v24 }
 0x11f   : > { %v467_v38 = vpop.f32.mrf.mxu0  ;;  %v507_v39 = vpop.f32.mrf.mxu1  ;;  %v2488_v42 = vadd.f32 %v505_v35, %v2457_v24  ;;  %v580_v53 = vmax.f32 %v2462_v28, %v2471_v33 }
 0x120   : > { %1074 = vst [vmem:[%s2474_s9] sm:$0xff] %v1847_v36  ;;  %1082 = vst [vmem:[%s2474_s9 + $0x80] sm:$0xff] %v1855_v37  ;;  %v2491_v43 = vadd.f32 %v467_v38, %v2459_v25  ;;  %v2494_v44 = vadd.f32 %v507_v39, %v2459_v25  ;;  %557 = vmax.xlane.f32.xlu0 %v556_v40 }
 0x121   : > { %v471_v45 = vpop.f32.mrf.mxu0  ;;  %v511_v46 = vpop.f32.mrf.mxu1 }
 0x122   : > { %v1848_v47 = vpack.c.bf16 %v2491_v43, %v2485_v41  ;;  %v1856_v48 = vpack.c.bf16 %v2494_v44, %v2488_v42  ;;  %v2501_v49 = vadd.f32 %v511_v46, %v2457_v24  ;;  %v2504_v50 = vadd.f32 %v471_v45, %v2457_v24 }
 0x123   : > { %v473_v51 = vpop.f32.mrf.mxu0  ;;  %v583_v52 = vmax.f32 %v2488_v42, %v2494_v44  ;;  %v513_v54 = vpop.f32.mrf.mxu1  ;;  %v559_v0 = vmax.f32 %v2485_v41, %v2491_v43 }
 0x124   : > { %1075 = vst [vmem:[%s2474_s9 + $0x10] sm:$0xff] %v1848_v47  ;;  %1083 = vst [vmem:[%s2474_s9 + $0x90] sm:$0xff] %v1856_v48  ;;  %v2513_v55 = vadd.f32 %v473_v51, %v2459_v25  ;;  %v2516_v56 = vadd.f32 %v513_v54, %v2459_v25  ;;  %581 = vmax.xlane.f32.xlu0 %v580_v53 }
 0x125   : > { %584 = vmax.xlane.f32.xlu1 %v583_v52  ;;  %v475_v57 = vpop.f32.mrf.mxu0  ;;  %v515_v58 = vpop.f32.mrf.mxu1 }
 0x126   : > { %v1849_v59 = vpack.c.bf16 %v2513_v55, %v2504_v50  ;;  %v1857_v60 = vpack.c.bf16 %v2516_v56, %v2501_v49  ;;  %v2523_v61 = vadd.f32 %v515_v58, %v2457_v24  ;;  %v562_v63 = vmax.f32 %v2504_v50, %v2513_v55 }
 0x127   : > { %v477_v62 = vpop.f32.mrf.mxu0  ;;  %v517_v1 = vpop.f32.mrf.mxu1  ;;  %v2531_v2 = vadd.f32 %v475_v57, %v2457_v24  ;;  %v586_v7 = vmax.f32 %v2501_v49, %v2516_v56 }
 0x128   : > { %1076 = vst [vmem:[%s2474_s9 + $0x20] sm:$0xff] %v1849_v59  ;;  %1084 = vst [vmem:[%s2474_s9 + $0xa0] sm:$0xff] %v1857_v60  ;;  %v2535_v3 = vadd.f32 %v477_v62, %v2459_v25  ;;  %v2538_v4 = vadd.f32 %v517_v1, %v2459_v25  ;;  %560 = vmax.xlane.f32.xlu0 %v559_v0 }
 0x129   : > { %563 = vmax.xlane.f32.xlu1 %v562_v63  ;;  %v481_v5 = vpop.f32.mrf.mxu0  ;;  %v521_v6 = vpop.f32.mrf.mxu1 }
 0x12a   : > { %v1850_v8 = vpack.c.bf16 %v2535_v3, %v2531_v2  ;;  %v2545_v9 = vadd.f32 %v481_v5, %v2457_v24  ;;  %v1858_v10 = vpack.c.bf16 %v2538_v4, %v2523_v61  ;;  %v565_v11 = vmax.f32 %v2531_v2, %v2535_v3 }
 0x12b   : > { %v483_v12 = vpop.f32.mrf.mxu0  ;;  %v2552_v13 = vadd.f32 %v521_v6, %v2457_v24  ;;  %v523_v14 = vpop.f32.mrf.mxu1  ;;  %v589_v23 = vmax.f32 %v2523_v61, %v2538_v4 }
 0x12c   : > { %1077 = vst [vmem:[%s2474_s9 + $0x30] sm:$0xff] %v1850_v8  ;;  %1085 = vst [vmem:[%s2474_s9 + $0xb0] sm:$0xff] %v1858_v10  ;;  %v2557_v15 = vadd.f32 %v483_v12, %v2459_v25  ;;  %v2560_v16 = vadd.f32 %v523_v14, %v2459_v25  ;;  %587 = vmax.xlane.f32.xlu0 %v586_v7 }
 0x12d   : > { %566 = vmax.xlane.f32.xlu1 %v565_v11  ;;  %v485_v17 = vpop.f32.mrf.mxu0  ;;  %v525_v18 = vpop.f32.mrf.mxu1 }
 0x12e   : > { %v1851_v19 = vpack.c.bf16 %v2557_v15, %v2545_v9  ;;  %v2565_v20 = vadd.f32 %v485_v17, %v2457_v24  ;;  %v1859_v21 = vpack.c.bf16 %v2560_v16, %v2552_v13  ;;  %v568_v27 = vmax.f32 %v2545_v9, %v2557_v15  ;;  %v2645_v17 = vld [vmem:[#allocation2 + $0x48] sm:$0xff] }
 0x12f   : > { %v487_v22 = vpop.f32.mrf.mxu0  ;;  %v527_v26 = vpop.f32.mrf.mxu1  ;;  %v2579_v30 = vadd.f32 %v525_v18, %v2457_v24  ;;  %v592_v37 = vmax.f32 %v2552_v13, %v2560_v16  ;;  %v2647_v18 = vld [vmem:[#allocation2 + $0x40] sm:$0xff] }
 0x130   : > { %1078 = vst [vmem:[%s2474_s9 + $0x40] sm:$0xff] %v1851_v19  ;;  %v2575_v29 = vadd.f32 %v487_v22, %v2459_v25  ;;  %1086 = vst [vmem:[%s2474_s9 + $0xc0] sm:$0xff] %v1859_v21  ;;  %v2582_v34 = vadd.f32 %v527_v26, %v2459_v25  ;;  %569 = vmax.xlane.f32.xlu0 %v568_v27  ;;  %v2660_v27 = vld [vmem:[#allocation2 + $0x10] sm:$0xff] }
 0x131   : > { %590 = vmax.xlane.f32.xlu1 %v589_v23  ;;  %v491_v35 = vpop.f32.mrf.mxu0  ;;  %v531_v36 = vpop.f32.mrf.mxu1 }
 0x132   : > { %v1852_v38 = vpack.c.bf16 %v2575_v29, %v2565_v20  ;;  %v2589_v39 = vadd.f32 %v491_v35, %v2457_v24  ;;  %v1860_v40 = vpack.c.bf16 %v2582_v34, %v2579_v30  ;;  %v571_v45 = vmax.f32 %v2565_v20, %v2575_v29  ;;  %v2662_v35 = vld [vmem:[#allocation2 + $0x8] sm:$0xff] }
 0x133   : > { %v493_v46 = vpop.f32.mrf.mxu0  ;;  %v2596_v47 = vadd.f32 %v531_v36, %v2457_v24  ;;  %v533_v48 = vpop.f32.mrf.mxu1  ;;  %v595_v54 = vmax.f32 %v2579_v30, %v2582_v34 }
 0x134   : > { %1079 = vst [vmem:[%s2474_s9 + $0x50] sm:$0xff] %v1852_v38  ;;  %v2600_v51 = vadd.f32 %v493_v46, %v2459_v25  ;;  %1087 = vst [vmem:[%s2474_s9 + $0xd0] sm:$0xff] %v1860_v40  ;;  %v2604_v52 = vadd.f32 %v533_v48, %v2459_v25  ;;  %593 = vmax.xlane.f32.xlu0 %v592_v37  ;;  %v2680_v48 = vld [vmem:[#allocation2 + $0x18] sm:$0xff]  ;;  %v2759_v37 = vld [vmem:[#allocation2 + $0x70] sm:$0xff] }
 0x135   : > { %572 = vmax.xlane.f32.xlu1 %v571_v45  ;;  %v495_v53 = vpop.f32.mrf.mxu0  ;;  %v535_v57 = vpop.f32.mrf.mxu1  ;;  %3276 = vst [vmem:[#allocation18_spill] sm:$0xff] %v2759_v37 }
 0x136   : > { %v1853_v58 = vpack.c.bf16 %v2600_v51, %v2589_v39  ;;  %v2611_v59 = vadd.f32 %v495_v53, %v2457_v24  ;;  %v1861_v60 = vpack.c.bf16 %v2604_v52, %v2596_v47  ;;  %v574_v0 = vmax.f32 %v2589_v39, %v2600_v51  ;;  %v2682_v53 = vld [vmem:[#allocation2 + $0x50] sm:$0xff] }
 0x137   : > { %v497_v62 = vpop.f32.mrf.mxu0  ;;  %v537_v63 = vpop.f32.mrf.mxu1  ;;  %v2623_v5 = vadd.f32 %v535_v57, %v2457_v24  ;;  %v598_v7 = vmax.f32 %v2596_v47, %v2604_v52 }
 0x138   : > { %1080 = vst [vmem:[%s2474_s9 + $0x60] sm:$0xff] %v1853_v58  ;;  %v2619_v1 = vadd.f32 %v497_v62, %v2459_v25  ;;  %1088 = vst [vmem:[%s2474_s9 + $0xe0] sm:$0xff] %v1861_v60  ;;  %v2626_v6 = vadd.f32 %v537_v63, %v2459_v25  ;;  %575 = vmax.xlane.f32.xlu0 %v574_v0  ;;  %v2640_v25 = vld [vmem:[#allocation2] sm:$0xff]  ;;  %v2699_v0 = vld [vmem:[#allocation2 + $0x58] sm:$0xff] }
 0x139   : > { %596 = vmax.xlane.f32.xlu1 %v595_v54  ;;  %v2757_v54 = vld [vmem:[#allocation2 + $0x38] sm:$0xff] }
 0x13a   : > { %v1854_v8 = vpack.c.bf16 %v2619_v1, %v2611_v59  ;;  %v1862_v10 = vpack.c.bf16 %v2626_v6, %v2623_v5  ;;  %v577_v11 = vmax.f32 %v2611_v59, %v2619_v1  ;;  %v601_v24 = vmax.f32 %v2623_v5, %v2626_v6  ;;  %3275 = vst [vmem:[#allocation17_spill] sm:$0xff] %v2757_v54 }
 0x13c   : > { %1081 = vst [vmem:[%s2474_s9 + $0x70] sm:$0xff] %v1854_v8  ;;  %1089 = vst [vmem:[%s2474_s9 + $0xf0] sm:$0xff] %v1862_v10  ;;  %599 = vmax.xlane.f32.xlu0 %v598_v7  ;;  %v2701_v7 = vld [vmem:[#allocation2 + $0x20] sm:$0xff]  ;;  %v2738_v8 = vld [vmem:[#allocation2 + $0x68] sm:$0xff] }
 0x13d   : > { %578 = vmax.xlane.f32.xlu1 %v577_v11  ;;  %3271 = vst [vmem:[#allocation13_spill] sm:$0xff] %v2738_v8  ;;  %v2740_v10 = vld [vmem:[#allocation2 + $0x30] sm:$0xff] }
 0x13e   : > { %3272 = vst [vmem:[#allocation14_spill] sm:$0xff] %v2740_v10 }
 0x141   : > { %602 = vmax.xlane.f32.xlu1 %v601_v24 }
 0x1a9   : > { %v558_v12 = vpop.xlane.xlu0 %557 }
 0x1aa   : > { %v2643_v14 = vmax.f32 %v2640_v25, %v558_v12 }
 0x1ac   : > { %957 = vst.msk [vmem:[#allocation2] sm:$0xff] %vm940_vm2, %v2643_v14  ;;  %702 = vperm.xlu0 %1994, %v2643_v14  }
 0x1ad   : > { %v582_v22 = vpop.xlane.xlu0 %581 }
 0x1ae   : > { %v585_v21 = vpop.xlane.xlu1 %584  ;;  %v2658_v26 = vmax.f32 %v2647_v18, %v582_v22  ;;  %v2718_v22 = vld [vmem:[#allocation2 + $0x28] sm:$0xff] }
 0x1af   : > { %v2655_v23 = vmax.f32 %v2645_v17, %v585_v21  ;;  %3267 = vst [vmem:[#allocation9_spill] sm:$0xff] %v2718_v22 }
 0x1b0   : > { %965 = vst.msk [vmem:[#allocation2 + $0x40] sm:$0xff] %vm940_vm2, %v2658_v26  ;;  %742 = vperm.xlu1 %1995, %v2658_v26  }
 0x1b1   : > { %966 = vst.msk [vmem:[#allocation2 + $0x48] sm:$0xff] %vm940_vm2, %v2655_v23  ;;  %747 = vperm.xlu0 %1994, %v2655_v23   ;;  %v561_v40 = vpop.xlane.xlu0 %560 }
 0x1b2   : > { %v564_v38 = vpop.xlane.xlu1 %563  ;;  %v2678_v46 = vmax.f32 %v2662_v35, %v561_v40 }
 0x1b3   : > { %v2675_v45 = vmax.f32 %v2660_v27, %v564_v38  ;;  %v2720_v38 = vld [vmem:[#allocation2 + $0x60] sm:$0xff] }
 0x1b4   : > { %958 = vst.msk [vmem:[#allocation2 + $0x8] sm:$0xff] %vm940_vm2, %v2678_v46  ;;  %707 = vperm.xlu1 %1995, %v2678_v46   ;;  %3268 = vst [vmem:[#allocation10_spill] sm:$0xff] %v2720_v38 }
 0x1b5   : > { %959 = vst.msk [vmem:[#allocation2 + $0x10] sm:$0xff] %vm940_vm2, %v2675_v45  ;;  %v588_v60 = vpop.xlane.xlu0 %587 }
 0x1b6   : > { %v567_v58 = vpop.xlane.xlu1 %566  ;;  %v2697_v63 = vmax.f32 %v2682_v53, %v588_v60 }
 0x1b7   : > { %v2694_v62 = vmax.f32 %v2680_v48, %v567_v58 }
 0x1b8   : > { %967 = vst.msk [vmem:[#allocation2 + $0x50] sm:$0xff] %vm940_vm2, %v2697_v63  ;;  %712 = vperm.xlu1 %1995, %v2675_v45  }
 0x1b9   : > { %960 = vst.msk [vmem:[#allocation2 + $0x18] sm:$0xff] %vm940_vm2, %v2694_v62  ;;  %v570_v24 = vpop.xlane.xlu0 %569 }
 0x1ba   : > { %v591_v11 = vpop.xlane.xlu1 %590  ;;  %v2716_v21 = vmax.f32 %v2701_v7, %v570_v24 }
 0x1bb   : > { %v2713_v12 = vmax.f32 %v2699_v0, %v591_v11 }
 0x1bc   : > { %3266 = vst [vmem:[#allocation8_spill] sm:$0xff] %v2716_v21  ;;  %752 = vperm.xlu1 %1995, %v2697_v63   ;;  %961 = vst.msk [vmem:[#allocation2 + $0x20] sm:$0xff] %vm940_vm2, %v2716_v21 }
 0x1bd   : > { %968 = vst.msk [vmem:[#allocation2 + $0x58] sm:$0xff] %vm940_vm2, %v2713_v12  ;;  %757 = vperm.xlu0 %1994, %v2713_v12   ;;  %v594_v11 = vpop.xlane.xlu0 %593 }
 0x1be   : > { %v573_v60 = vpop.xlane.xlu1 %572  ;;  %v2736_v40 = vmax.f32 %v2720_v38, %v594_v11 }
 0x1bf   : > { %v2733_v24 = vmax.f32 %v2718_v22, %v573_v60 }
 0x1c0   : > { %3270 = vst [vmem:[#allocation12_spill] sm:$0xff] %v2736_v40  ;;  %717 = vperm.xlu1 %1995, %v2694_v62   ;;  %969 = vst.msk [vmem:[#allocation2 + $0x60] sm:$0xff] %vm940_vm2, %v2736_v40 }
 0x1c1   : > { %3269 = vst [vmem:[#allocation11_spill] sm:$0xff] %v2733_v24  ;;  %962 = vst.msk [vmem:[#allocation2 + $0x28] sm:$0xff] %vm940_vm2, %v2733_v24  ;;  %v576_v11 = vpop.xlane.xlu0 %575 }
 0x1c2   : > { %v597_v60 = vpop.xlane.xlu1 %596  ;;  %v2755_v36 = vmax.f32 %v2740_v10, %v576_v11 }
 0x1c3   : > { %v2752_v57 = vmax.f32 %v2738_v8, %v597_v60  ;;  %v2777_v8 = vld [vmem:[#allocation2 + $0x78] sm:$0xff] }
 0x1c4   : > { %3274 = vst [vmem:[#allocation16_spill] sm:$0xff] %v2755_v36  ;;  %722 = vperm.xlu1 %1995, %v2716_v21   ;;  %963 = vst.msk [vmem:[#allocation2 + $0x30] sm:$0xff] %vm940_vm2, %v2755_v36 }
 0x1c5   : > { %3273 = vst [vmem:[#allocation15_spill] sm:$0xff] %v2752_v57  ;;  %970 = vst.msk [vmem:[#allocation2 + $0x68] sm:$0xff] %vm940_vm2, %v2752_v57  ;;  %767 = vperm.xlu0 %1994, %v2752_v57   ;;  %v600_v58 = vpop.xlane.xlu0 %599 }
 0x1c6   : > { %v579_v11 = vpop.xlane.xlu1 %578  ;;  %v2775_v19 = vmax.f32 %v2759_v37, %v600_v58  ;;  %3279 = vst [vmem:[#allocation21_spill] sm:$0xff] %v2777_v8 }
 0x1c7   : > { %v2772_v22 = vmax.f32 %v2757_v54, %v579_v11 }
 0x1c8   : > { %3278 = vst [vmem:[#allocation20_spill] sm:$0xff] %v2775_v19  ;;  %762 = vperm.xlu1 %1995, %v2736_v40   ;;  %971 = vst.msk [vmem:[#allocation2 + $0x70] sm:$0xff] %vm940_vm2, %v2775_v19 }
 0x1c9   : > { %3277 = vst [vmem:[#allocation19_spill] sm:$0xff] %v2772_v22  ;;  %964 = vst.msk [vmem:[#allocation2 + $0x38] sm:$0xff] %vm940_vm2, %v2772_v22 }
 0x1ca   : > { %v603_v11 = vpop.xlane.xlu1 %602 }
 0x1cb   : > { %v2789_v58 = vmax.f32 %v2777_v8, %v603_v11 }
 0x1cc   : > { %727 = vperm.xlu1 %1995, %v2733_v24  }
 0x1cd   : > { %3280 = vst [vmem:[#allocation22_spill] sm:$0xff] %v2789_v58  ;;  %972 = vst.msk [vmem:[#allocation2 + $0x78] sm:$0xff] %vm940_vm2, %v2789_v58  ;;  %777 = vperm.xlu0 %1994, %v2789_v58  }
 0x1d0   : > { %732 = vperm.xlu1 %1995, %v2755_v36  }
 0x1d4   : > { %737 = vperm.xlu1 %1995, %v2772_v22  }
 0x1d8   : > { %772 = vperm.xlu1 %1995, %v2775_v19  }
 0x227   : > { %v703_v60 = vpop.permute.xlu0 %702 }
 0x228   : > { %v780_v11 = vsub.f32 %v2465_v31, %v703_v60  ;;  %v781_v57 = vsub.f32 %v2468_v32, %v703_v60 }
 0x22a   : > { %v812_v37 = vmul.f32 1.442695, %v780_v11  ;;  %v814_v10 = vmul.f32 1.442695, %v781_v57 }
 0x22b   : > { %v743_v8 = vpop.permute.xlu1 %742 }
 0x22c   : > { %v748_v54 = vpop.permute.xlu0 %747  ;;  %2010 = vpow2.f32 %v812_v37  ;;  %v796_v58 = vsub.f32 %v2462_v28, %v743_v8  ;;  %v797_v24 = vsub.f32 %v2471_v33, %v743_v8 }
 0x22d   : > { %v798_v36 = vsub.f32 %v2488_v42, %v748_v54  ;;  %2012 = vpow2.f32 %v814_v10  ;;  %v799_v22 = vsub.f32 %v2494_v44, %v748_v54 }
 0x22e   : > { %v844_v19 = vmul.f32 1.442695, %v796_v58  ;;  %v846_v40 = vmul.f32 1.442695, %v797_v24 }
 0x22f   : > { %v848_v38 = vmul.f32 1.442695, %v798_v36  ;;  %v850_v31 = vmul.f32 1.442695, %v799_v22  ;;  %v708_v21 = vpop.permute.xlu1 %707 }
 0x230   : > { %2014 = vpow2.f32 %v844_v19  ;;  %v782_v32 = vsub.f32 %v2485_v41, %v708_v21  ;;  %v783_v57 = vsub.f32 %v2491_v43, %v708_v21 }
 0x231   : > { %2016 = vpow2.f32 %v846_v40 }
 0x232   : > { %2018 = vpow2.f32 %v848_v38  ;;  %v816_v28 = vmul.f32 1.442695, %v782_v32  ;;  %v818_v37 = vmul.f32 1.442695, %v783_v57 }
 0x233   : > { %2020 = vpow2.f32 %v850_v31  ;;  %v713_v33 = vpop.permute.xlu1 %712 }
 0x234   : > { %2022 = vpow2.f32 %v816_v28  ;;  %v784_v42 = vsub.f32 %v2504_v50, %v713_v33  ;;  %v785_v44 = vsub.f32 %v2513_v55, %v713_v33 }
 0x235   : > { %2024 = vpow2.f32 %v818_v37 }
 0x236   : > { %v820_v36 = vmul.f32 1.442695, %v784_v42  ;;  %v822_v54 = vmul.f32 1.442695, %v785_v44 }
 0x237   : > { %v753_v8 = vpop.permute.xlu1 %752 }
 0x238   : > { %v758_v19 = vpop.permute.xlu0 %757  ;;  %2026 = vpow2.f32 %v820_v36  ;;  %v800_v41 = vsub.f32 %v2501_v49, %v753_v8  ;;  %v801_v43 = vsub.f32 %v2516_v56, %v753_v8 }
 0x239   : > { %v2011_v10 = vpop.eup %2010  ;;  %2028 = vpow2.f32 %v822_v54  ;;  %v802_v40 = vsub.f32 %v2523_v61, %v758_v19  ;;  %v803_v50 = vsub.f32 %v2538_v4, %v758_v19 }
 0x23a   : > { %v2013_v21 = vpop.eup %2012  ;;  %v852_v22 = vmul.f32 1.442695, %v800_v41  ;;  %v854_v38 = vmul.f32 1.442695, %v801_v43 }
 0x23b   : > { %v718_v55 = vpop.permute.xlu1 %717  ;;  %v876_v24 = vadd.f32 %v2013_v21, %v2011_v10  ;;  %v856_v56 = vmul.f32 1.442695, %v802_v40  ;;  %v858_v28 = vmul.f32 1.442695, %v803_v50 }
 0x23c   : > { %2030 = vpow2.f32 %v852_v22  ;;  %v786_v60 = vsub.f32 %v2531_v2, %v718_v55  ;;  %v787_v58 = vsub.f32 %v2535_v3, %v718_v55 }
 0x23d   : > { %v2015_v11 = vpop.eup %2014  ;;  %2032 = vpow2.f32 %v854_v38  ;;  %877 = vadd.xlane.f32.xlu1 %v876_v24 }
 0x23e   : > { %v2017_v49 = vpop.eup %2016  ;;  %v824_v31 = vmul.f32 1.442695, %v786_v60  ;;  %v826_v32 = vmul.f32 1.442695, %v787_v58 }
 0x23f   : > { %v2019_v57 = vpop.eup %2018  ;;  %v723_v37 = vpop.permute.xlu1 %722  ;;  %v900_v61 = vadd.f32 %v2017_v49, %v2015_v11 }
 0x240   : > { %v2021_v33 = vpop.eup %2020  ;;  %2034 = vpow2.f32 %v824_v31  ;;  %v788_v4 = vsub.f32 %v2545_v9, %v723_v37  ;;  %v789_v42 = vsub.f32 %v2557_v15, %v723_v37  ;;  %v768_v8 = vpop.permute.xlu0 %767 }
 0x241   : > { %v2023_v2 = vpop.eup %2022  ;;  %2036 = vpow2.f32 %v826_v32  ;;  %901 = vadd.xlane.f32.xlu0 %v900_v61  ;;  %v903_v3 = vadd.f32 %v2021_v33, %v2019_v57  ;;  %v806_v21 = vsub.f32 %v2579_v30, %v768_v8  ;;  %v807_v40 = vsub.f32 %v2582_v34, %v768_v8 }
 0x242   : > { %v2025_v44 = vpop.eup %2024  ;;  %2038 = vpow2.f32 %v856_v56  ;;  %v828_v36 = vmul.f32 1.442695, %v788_v4  ;;  %v830_v54 = vmul.f32 1.442695, %v789_v42 }
 0x243   : > { %2040 = vpow2.f32 %v858_v28  ;;  %904 = vadd.xlane.f32.xlu1 %v903_v3  ;;  %v763_v19 = vpop.permute.xlu1 %762  ;;  %v879_v41 = vadd.f32 %v2025_v44, %v2023_v2  ;;  %v864_v58 = vmul.f32 1.442695, %v806_v21  ;;  %v866_v56 = vmul.f32 1.442695, %v807_v40 }
 0x244   : > { %2042 = vpow2.f32 %v828_v36  ;;  %v804_v43 = vsub.f32 %v2552_v13, %v763_v19  ;;  %v805_v9 = vsub.f32 %v2560_v16, %v763_v19 }
 0x245   : > { %v2027_v10 = vpop.eup %2026  ;;  %2044 = vpow2.f32 %v830_v54  ;;  %880 = vadd.xlane.f32.xlu0 %v879_v41 }
 0x246   : > { %v2029_v15 = vpop.eup %2028  ;;  %v860_v22 = vmul.f32 1.442695, %v804_v43  ;;  %v862_v38 = vmul.f32 1.442695, %v805_v9 }
 0x247   : > { %v728_v50 = vpop.permute.xlu1 %727  ;;  %v882_v55 = vadd.f32 %v2029_v15, %v2027_v10 }
 0x248   : > { %2046 = vpow2.f32 %v860_v22  ;;  %v790_v24 = vsub.f32 %v2565_v20, %v728_v50  ;;  %v791_v60 = vsub.f32 %v2575_v29, %v728_v50  ;;  %v778_v30 = vpop.permute.xlu0 %777 }
 0x249   : > { %v2031_v13 = vpop.eup %2030  ;;  %2048 = vpow2.f32 %v862_v38  ;;  %883 = vadd.xlane.f32.xlu0 %v882_v55  ;;  %v810_v29 = vsub.f32 %v2623_v5, %v778_v30  ;;  %v811_v4 = vsub.f32 %v2626_v6, %v778_v30 }
 0x24a   : > { %v2033_v16 = vpop.eup %2032  ;;  %v832_v11 = vmul.f32 1.442695, %v790_v24  ;;  %v834_v49 = vmul.f32 1.442695, %v791_v60 }
 0x24b   : > { %v733_v31 = vpop.permute.xlu1 %732  ;;  %v906_v32 = vadd.f32 %v2033_v16, %v2031_v13  ;;  %v872_v54 = vmul.f32 1.442695, %v810_v29  ;;  %v874_v19 = vmul.f32 1.442695, %v811_v4 }
 0x24c   : > { %2050 = vpow2.f32 %v832_v11  ;;  %v792_v34 = vsub.f32 %v2589_v39, %v733_v31  ;;  %v793_v57 = vsub.f32 %v2600_v51, %v733_v31 }
 0x24d   : > { %v2035_v28 = vpop.eup %2034  ;;  %2052 = vpow2.f32 %v834_v49  ;;  %907 = vadd.xlane.f32.xlu0 %v906_v32 }
 0x24e   : > { %v2037_v20 = vpop.eup %2036  ;;  %2054 = vpow2.f32 %v864_v58  ;;  %v836_v37 = vmul.f32 1.442695, %v792_v34  ;;  %v838_v61 = vmul.f32 1.442695, %v793_v57  ;;  %v3281_v57 = vsub.f32 %v2640_v25, %v2643_v14 }
 0x24f   : > { %v2039_v33 = vpop.eup %2038  ;;  %2056 = vpow2.f32 %v866_v56  ;;  %v738_v42 = vpop.permute.xlu1 %737  ;;  %v885_v2 = vadd.f32 %v2037_v20, %v2035_v28  ;;  %v3282_v20 = vsub.f32 %v2647_v18, %v2658_v26  ;;  %v3286_v14 = vsub.f32 %v2682_v53, %v2697_v63  ;;  %v3289_v53 = vld [vmem:[#allocation8_spill] sm:$0xff] }
 0x250   : > { %v2041_v3 = vpop.eup %2040  ;;  %2058 = vpow2.f32 %v836_v37  ;;  %v794_v39 = vsub.f32 %v2611_v59, %v738_v42  ;;  %v795_v51 = vsub.f32 %v2619_v1, %v738_v42  ;;  %v652_v28 = vmul.f32 1.442695, %v3281_v57 }
 0x251   : > { %v2043_v44 = vpop.eup %2042  ;;  %2060 = vpow2.f32 %v838_v61  ;;  %886 = vadd.xlane.f32.xlu1 %v885_v2  ;;  %v909_v9 = vadd.f32 %v2041_v3, %v2039_v33  ;;  %v668_v29 = vmul.f32 1.442695, %v3282_v20  ;;  %v3283_v37 = vsub.f32 %v2645_v17, %v2655_v23  ;;  %v620_v2 = vld [vmem:[#allocation3] sm:$0xff] }
 0x252   : > { %v2045_v36 = vpop.eup %2044  ;;  %v840_v5 = vmul.f32 1.442695, %v794_v39  ;;  %v842_v8 = vmul.f32 1.442695, %v795_v51  ;;  %v3284_v33 = vsub.f32 %v2662_v35, %v2678_v46  ;;  %v3285_v42 = vsub.f32 %v2660_v27, %v2675_v45  ;;  %v628_v39 = vld [vmem:[#allocation3 + $0x40] sm:$0xff] }
 0x253   : > { %v773_v41 = vpop.permute.xlu1 %772  ;;  %v888_v43 = vadd.f32 %v2045_v36, %v2043_v44  ;;  %v670_v61 = vmul.f32 1.442695, %v3283_v37  ;;  %v672_v18 = vmul.f32 1.442695, %v3286_v14  ;;  %v3287_v17 = vsub.f32 %v2680_v48, %v2694_v62  ;;  %v629_v36 = vld [vmem:[#allocation3 + $0x48] sm:$0xff] }
 0x254   : > { %2062 = vpow2.f32 %v840_v5  ;;  %v808_v6 = vsub.f32 %v2596_v47, %v773_v41  ;;  %v809_v10 = vsub.f32 %v2604_v52, %v773_v41  ;;  %v654_v4 = vmul.f32 1.442695, %v3284_v33  ;;  %v3303_v37 = vld [vmem:[#allocation17_spill] sm:$0xff] }
 0x255   : > { %v2047_v15 = vpop.eup %2046  ;;  %2064 = vpow2.f32 %v842_v8  ;;  %889 = vadd.xlane.f32.xlu0 %v888_v43  ;;  %910 = vadd.xlane.f32.xlu1 %v909_v9  ;;  %v656_v25 = vmul.f32 1.442695, %v3285_v42  ;;  %v658_v23 = vmul.f32 1.442695, %v3287_v17  ;;  %v3288_v45 = vsub.f32 %v2699_v0, %v2713_v12  ;;  %v621_v8 = vld [vmem:[#allocation3 + $0x8] sm:$0xff]  ;;  %v3291_v9 = vld [vmem:[#allocation10_spill] sm:$0xff] }
 0x256   : > { %v2049_v59 = vpop.eup %2048  ;;  %2066 = vpow2.f32 %v872_v54  ;;  %v868_v1 = vmul.f32 1.442695, %v808_v6  ;;  %v870_v21 = vmul.f32 1.442695, %v809_v10  ;;  %v3290_v63 = vsub.f32 %v2701_v7, %v3289_v53  ;;  %v3292_v0 = vld [vmem:[#allocation12_spill] sm:$0xff]  ;;  %v3306_v17 = vld [vmem:[#allocation18_spill] sm:$0xff] }
 0x257   : > { %2068 = vpow2.f32 %v874_v19  ;;  %v912_v22 = vadd.f32 %v2049_v59, %v2047_v15  ;;  %v674_v44 = vmul.f32 1.442695, %v3288_v45  ;;  %v3293_v12 = vsub.f32 %v3291_v9, %v3292_v0 }
 0x258   : > { %2070 = vpow2.f32 %v868_v1  ;;  %v660_v54 = vmul.f32 1.442695, %v3290_v63  ;;  %v622_v1 = vld [vmem:[#allocation3 + $0x10] sm:$0xff] }
 0x259   : > { %v2051_v38 = vpop.eup %2050  ;;  %2072 = vpow2.f32 %v870_v21  ;;  %913 = vadd.xlane.f32.xlu0 %v912_v22  ;;  %v676_v6 = vmul.f32 1.442695, %v3293_v12  ;;  %v3294_v22 = vld [vmem:[#allocation9_spill] sm:$0xff] }
 0x25a   : > { %v2053_v40 = vpop.eup %2052  ;;  %2074 = vpow2.f32 %v652_v28  ;;  %v623_v28 = vld [vmem:[#allocation3 + $0x18] sm:$0xff] }
 0x25b   : > { %v2055_v50 = vpop.eup %2054  ;;  %v891_v55 = vadd.f32 %v2053_v40, %v2051_v38  ;;  %2076 = vpow2.f32 %v668_v29  ;;  %v3295_v38 = vld [vmem:[#allocation11_spill] sm:$0xff] }
 0x25c   : > { %v2057_v47 = vpop.eup %2056  ;;  %2078 = vpow2.f32 %v670_v61  ;;  %v3296_v40 = vsub.f32 %v3294_v22, %v3295_v38  ;;  %v3304_v61 = vld [vmem:[#allocation19_spill] sm:$0xff] }
 0x25d   : > { %v2059_v24 = vpop.eup %2058  ;;  %892 = vadd.xlane.f32.xlu1 %v891_v55  ;;  %v915_v13 = vadd.f32 %v2057_v47, %v2055_v50  ;;  %2080 = vpow2.f32 %v654_v4  ;;  %v3305_v33 = vsub.f32 %v3303_v37, %v3304_v61 }
 0x25e   : > { %v2061_v52 = vpop.eup %2060  ;;  %2082 = vpow2.f32 %v656_v25  ;;  %v662_v50 = vmul.f32 1.442695, %v3296_v40  ;;  %v627_v40 = vld [vmem:[#allocation3 + $0x38] sm:$0xff] }
 0x25f   : > { %v894_v60 = vadd.f32 %v2061_v52, %v2059_v24  ;;  %2084 = vpow2.f32 %v672_v18  ;;  %v630_v52 = vld [vmem:[#allocation3 + $0x50] sm:$0xff]  ;;  %v666_v4 = vmul.f32 1.442695, %v3305_v33  ;;  %v631_v18 = vld [vmem:[#allocation3 + $0x58] sm:$0xff] }
 0x260   : > { %2086 = vpow2.f32 %v658_v23  ;;  %v3307_v23 = vld [vmem:[#allocation20_spill] sm:$0xff] }
 0x261   : > { %v2063_v16 = vpop.eup %2062  ;;  %895 = vadd.xlane.f32.xlu0 %v894_v60  ;;  %916 = vadd.xlane.f32.xlu1 %v915_v13  ;;  %2088 = vpow2.f32 %v674_v44  ;;  %v3297_v13 = vld [vmem:[#allocation13_spill] sm:$0xff] }
 0x262   : > { %v2065_v58 = vpop.eup %2064  ;;  %2090 = vpow2.f32 %v660_v54  ;;  %v632_v54 = vld [vmem:[#allocation3 + $0x60] sm:$0xff] }
 0x263   : > { %v2067_v11 = vpop.eup %2066  ;;  %v897_v49 = vadd.f32 %v2065_v58, %v2063_v16  ;;  %2092 = vpow2.f32 %v676_v6  ;;  %v3298_v16 = vld [vmem:[#allocation15_spill] sm:$0xff] }
 0x264   : > { %v2069_v56 = vpop.eup %2068  ;;  %v3299_v58 = vsub.f32 %v3297_v13, %v3298_v16  ;;  %2094 = vpow2.f32 %v662_v50  ;;  %v635_v13 = vld [vmem:[#allocation3 + $0x78] sm:$0xff]  ;;  %v634_v16 = vld [vmem:[#allocation3 + $0x70] sm:$0xff] }
 0x265   : > { %v2071_v30 = vpop.eup %2070  ;;  %898 = vadd.xlane.f32.xlu1 %v897_v49  ;;  %v921_v34 = vadd.f32 %v2069_v56, %v2067_v11  ;;  %v3300_v49 = vld [vmem:[#allocation14_spill] sm:$0xff]  ;;  %v3301_v56 = vld [vmem:[#allocation16_spill] sm:$0xff] }
 0x266   : > { %v2073_v31 = vpop.eup %2072  ;;  %v678_v11 = vmul.f32 1.442695, %v3299_v58 }
 0x267   : > { %v918_v32 = vadd.f32 %v2073_v31, %v2071_v30  ;;  %v2075_v26 = vpop.eup %2074  ;;  %v3302_v30 = vsub.f32 %v3300_v49, %v3301_v56 }
 0x268   : > { %v684_v35 = vmul.f32 %v2075_v26, %v620_v2  ;;  %v2077_v46 = vpop.eup %2076  ;;  %2096 = vpow2.f32 %v678_v11  ;;  %v624_v26 = vld [vmem:[#allocation3 + $0x20] sm:$0xff] }
 0x269   : > { %919 = vadd.xlane.f32.xlu0 %v918_v32  ;;  %922 = vadd.xlane.f32.xlu1 %v921_v34  ;;  %v2079_v27 = vpop.eup %2078  ;;  %v692_v48 = vmul.f32 %v2077_v46, %v628_v39  ;;  %v664_v31 = vmul.f32 1.442695, %v3302_v30  ;;  %v3310_v39 = vld [vmem:[#allocation22_spill] sm:$0xff] }
 0x26a   : > { %v2081_v62 = vpop.eup %2080  ;;  %v693_v19 = vmul.f32 %v2079_v27, %v629_v36 }
 0x26b   : > { %v685_v7 = vmul.f32 %v2081_v62, %v621_v8  ;;  %v2083_v15 = vpop.eup %2082  ;;  %2098 = vpow2.f32 %v664_v31 }
 0x26c   : > { %v686_v55 = vmul.f32 %v2083_v15, %v622_v1  ;;  %v2085_v47 = vpop.eup %2084  ;;  %2100 = vpow2.f32 %v666_v4 }
 0x26d   : > { %v694_v32 = vmul.f32 %v2085_v47, %v630_v52  ;;  %v2087_v34 = vpop.eup %2086 }
 0x26e   : > { %v2089_v29 = vpop.eup %2088  ;;  %v687_v42 = vmul.f32 %v2087_v34, %v623_v28 }
 0x26f   : > { %v2091_v25 = vpop.eup %2090  ;;  %v695_v45 = vmul.f32 %v2089_v29, %v631_v18 }
 0x270   : > { %v688_v44 = vmul.f32 %v2091_v25, %v624_v26  ;;  %v2093_v36 = vpop.eup %2092 }
 0x271   : > { %v2095_v8 = vpop.eup %2094 }
 0x275   : > { %v2097_v9 = vpop.eup %2096 }
 0x278   : > { %v2099_v12 = vpop.eup %2098 }
 0x2c6   : > { %v878_v3 = vpop.xlane.xlu1 %877 }
 0x2c7   : > { %v924_v51 = vadd.f32 %v878_v3, %v684_v35  ;;  %v3308_v35 = vsub.f32 %v3306_v17, %v3307_v23  ;;  %v3309_v3 = vld [vmem:[#allocation21_spill] sm:$0xff] }
 0x2c9   : > { %941 = vst.msk [vmem:[#allocation3] sm:$0xff] %vm940_vm2, %v924_v51  ;;  %v680_v46 = vmul.f32 1.442695, %v3308_v35  ;;  %v3311_v51 = vsub.f32 %v3309_v3, %v3310_v39 }
 0x2ca   : > { %v902_v5 = vpop.xlane.xlu0 %901 }
 0x2cb   : > { %v932_v41 = vadd.f32 %v902_v5, %v692_v48  ;;  %v682_v27 = vmul.f32 1.442695, %v3311_v51  ;;  %2102 = vpow2.f32 %v680_v46  ;;  %v696_v5 = vmul.f32 %v2093_v36, %v632_v54 }
 0x2cc   : > { %v905_v43 = vpop.xlane.xlu1 %904 }
 0x2cd   : > { %v933_v10 = vadd.f32 %v905_v43, %v693_v19  ;;  %949 = vst.msk [vmem:[#allocation3 + $0x40] sm:$0xff] %vm940_vm2, %v932_v41  ;;  %2104 = vpow2.f32 %v682_v27  ;;  %v625_v41 = vld [vmem:[#allocation3 + $0x28] sm:$0xff] }
 0x2ce   : > { %v881_v59 = vpop.xlane.xlu0 %880  ;;  %v689_v0 = vmul.f32 %v2095_v8, %v625_v41 }
 0x2cf   : > { %950 = vst.msk [vmem:[#allocation3 + $0x48] sm:$0xff] %vm940_vm2, %v933_v10  ;;  %v925_v21 = vadd.f32 %v881_v59, %v685_v7  ;;  %v633_v10 = vld [vmem:[#allocation3 + $0x68] sm:$0xff]  ;;  %v626_v7 = vld [vmem:[#allocation3 + $0x30] sm:$0xff] }
 0x2d0   : > { %v697_v59 = vmul.f32 %v2097_v9, %v633_v10  ;;  %v690_v1 = vmul.f32 %v2099_v12, %v626_v7 }
 0x2d1   : > { %942 = vst.msk [vmem:[#allocation3 + $0x8] sm:$0xff] %vm940_vm2, %v925_v21  ;;  %v2101_v21 = vpop.eup %2100 }
 0x2d2   : > { %v884_v24 = vpop.xlane.xlu0 %883 }
 0x2d3   : > { %v926_v60 = vadd.f32 %v884_v24, %v686_v55  ;;  %v691_v24 = vmul.f32 %v2101_v21, %v627_v40 }
 0x2d5   : > { %943 = vst.msk [vmem:[#allocation3 + $0x10] sm:$0xff] %vm940_vm2, %v926_v60 }
 0x2d6   : > { %v908_v57 = vpop.xlane.xlu0 %907 }
 0x2d7   : > { %v934_v20 = vadd.f32 %v908_v57, %v694_v32 }
 0x2d8   : > { %v2103_v47 = vpop.eup %2102 }
 0x2d9   : > { %951 = vst.msk [vmem:[#allocation3 + $0x50] sm:$0xff] %vm940_vm2, %v934_v20  ;;  %v698_v49 = vmul.f32 %v2103_v47, %v634_v16 }
 0x2da   : > { %v887_v14 = vpop.xlane.xlu1 %886  ;;  %v2105_v52 = vpop.eup %2104 }
 0x2db   : > { %v927_v2 = vadd.f32 %v887_v14, %v687_v42  ;;  %v699_v11 = vmul.f32 %v2105_v52, %v635_v13 }
 0x2dd   : > { %944 = vst.msk [vmem:[#allocation3 + $0x18] sm:$0xff] %vm940_vm2, %v927_v2 }
 0x2de   : > { %v911_v53 = vpop.xlane.xlu1 %910  ;;  %v890_v63 = vpop.xlane.xlu0 %889 }
 0x2df   : > { %v935_v48 = vadd.f32 %v911_v53, %v695_v45  ;;  %v928_v62 = vadd.f32 %v890_v63, %v688_v44 }
 0x2e1   : > { %952 = vst.msk [vmem:[#allocation3 + $0x58] sm:$0xff] %vm940_vm2, %v935_v48  ;;  %945 = vst.msk [vmem:[#allocation3 + $0x20] sm:$0xff] %vm940_vm2, %v928_v62 }
 0x2e2   : > { %v914_v19 = vpop.xlane.xlu0 %913 }
 0x2e3   : > { %v936_v43 = vadd.f32 %v914_v19, %v696_v5 }
 0x2e5   : > { %953 = vst.msk [vmem:[#allocation3 + $0x60] sm:$0xff] %vm940_vm2, %v936_v43 }
 0x2e6   : > { %v893_v6 = vpop.xlane.xlu1 %892 }
 0x2e7   : > { %v929_v15 = vadd.f32 %v893_v6, %v689_v0 }
 0x2e9   : > { %946 = vst.msk [vmem:[#allocation3 + $0x28] sm:$0xff] %vm940_vm2, %v929_v15 }
 0x2ea   : > { %v917_v22 = vpop.xlane.xlu1 %916  ;;  %v896_v38 = vpop.xlane.xlu0 %895 }
 0x2eb   : > { %v937_v50 = vadd.f32 %v917_v22, %v697_v59  ;;  %v930_v55 = vadd.f32 %v896_v38, %v690_v1 }
 0x2ed   : > { %954 = vst.msk [vmem:[#allocation3 + $0x68] sm:$0xff] %vm940_vm2, %v937_v50  ;;  %947 = vst.msk [vmem:[#allocation3 + $0x30] sm:$0xff] %vm940_vm2, %v930_v55 }
 0x2ee   : > { %v899_v60 = vpop.xlane.xlu1 %898 }
 0x2ef   : > { %v931_v58 = vadd.f32 %v899_v60, %v691_v24 }
 0x2f1   : > { %948 = vst.msk [vmem:[#allocation3 + $0x38] sm:$0xff] %vm940_vm2, %v931_v58  ;;  %1093 = sbr.rel (%p1807_p6) target bundleno = 936 (0x3a8), region = 78 }
 0x2f2   : > { %v923_v56 = vpop.xlane.xlu1 %922  ;;  %v920_v30 = vpop.xlane.xlu0 %919 }
 0x2f3   : > { %v939_v31 = vadd.f32 %v923_v56, %v699_v11  ;;  %v938_v32 = vadd.f32 %v920_v30, %v698_v49 }
 0x2f5   : > { %956 = vst.msk [vmem:[#allocation3 + $0x78] sm:$0xff] %vm940_vm2, %v939_v31  ;;  %955 = vst.msk [vmem:[#allocation3 + $0x70] sm:$0xff] %vm940_vm2, %v938_v32 }
 0x2f6   : > { %v1112_v34 = vld [vmem:[#allocation3 + $0x10] sm:$0xff]  ;;  %v2253_v57 = vmov 0   ;;  %v1110_v28 = vld [vmem:[#allocation3] sm:$0xff]  ;;  %v1113_v20 = vld [vmem:[#allocation3 + $0x18] sm:$0xff] }
 0x2f7   : > { %2107 = vset.pattern.permute.xlu1 %v2253_v57  ;;  %2106 = vset.pattern.permute.xlu0 %v2253_v57  ;;  %2108 = vlog2.f32 %v1112_v34  ;;  %v1111_v29 = vld [vmem:[#allocation3 + $0x8] sm:$0xff]  ;;  %v1114_v61 = vld [vmem:[#allocation3 + $0x20] sm:$0xff]  ;;  %v1116_v4 = vld [vmem:[#allocation3 + $0x30] sm:$0xff] }
 0x2f8   : > { %2110 = vlog2.f32 %v1110_v28  ;;  %v1115_v37 = vld [vmem:[#allocation3 + $0x28] sm:$0xff]  ;;  %v1117_v33 = vld [vmem:[#allocation3 + $0x38] sm:$0xff]  ;;  %v1118_v25 = vld [vmem:[#allocation3 + $0x40] sm:$0xff] }
 0x2f9   : > { %2112 = vlog2.f32 %v1113_v20  ;;  %v1119_v42 = vld [vmem:[#allocation3 + $0x48] sm:$0xff]  ;;  %v1121_v14 = vld [vmem:[#allocation3 + $0x58] sm:$0xff]  ;;  %v1120_v18 = vld [vmem:[#allocation3 + $0x50] sm:$0xff] }
 0x2fa   : > { %2114 = vlog2.f32 %v1111_v29  ;;  %v1096_v2 = vld [vmem:[#allocation2 + $0x10] sm:$0xff]  ;;  %v1094_v35 = vld [vmem:[#allocation2] sm:$0xff]  ;;  %v1097_v39 = vld [vmem:[#allocation2 + $0x18] sm:$0xff] }
 0x2fb   : > { %2116 = vlog2.f32 %v1115_v37  ;;  %v1123_v51 = vld [vmem:[#allocation3 + $0x68] sm:$0xff]  ;;  %v1122_v53 = vld [vmem:[#allocation3 + $0x60] sm:$0xff]  ;;  %v1101_v21 = vld [vmem:[#allocation2 + $0x38] sm:$0xff] }
 0x2fc   : > { %2118 = vlog2.f32 %v1114_v61  ;;  %v1095_v36 = vld [vmem:[#allocation2 + $0x8] sm:$0xff]  ;;  %v1125_v0 = vld [vmem:[#allocation3 + $0x78] sm:$0xff]  ;;  %v1098_v6 = vld [vmem:[#allocation2 + $0x20] sm:$0xff] }
 0x2fd   : > { %2120 = vlog2.f32 %v1117_v33  ;;  %v1099_v43 = vld [vmem:[#allocation2 + $0x28] sm:$0xff]  ;;  %v1124_v10 = vld [vmem:[#allocation3 + $0x70] sm:$0xff]  ;;  %v1102_v16 = vld [vmem:[#allocation2 + $0x40] sm:$0xff] }
 0x2fe   : > { %2122 = vlog2.f32 %v1116_v4  ;;  %v1100_v40 = vld [vmem:[#allocation2 + $0x30] sm:$0xff]  ;;  %v1103_v52 = vld [vmem:[#allocation2 + $0x48] sm:$0xff]  ;;  %v1105_v30 = vld [vmem:[#allocation2 + $0x58] sm:$0xff] }
 0x2ff   : > { %2124 = vlog2.f32 %v1119_v42  ;;  %v1104_v34 = vld [vmem:[#allocation2 + $0x50] sm:$0xff]  ;;  %v1107_v37 = vld [vmem:[#allocation2 + $0x68] sm:$0xff]  ;;  %v1106_v4 = vld [vmem:[#allocation2 + $0x60] sm:$0xff] }
 0x300   : > { %2126 = vlog2.f32 %v1118_v25 }
 0x301   : > { %2128 = vlog2.f32 %v1121_v14 }
 0x302   : > { %2130 = vlog2.f32 %v1120_v18  ;;  %v1109_v18 = vld [vmem:[#allocation2 + $0x78] sm:$0xff] }
 0x303   : > { %2132 = vlog2.f32 %v1123_v51  ;;  %v2910_v51 = vld [vmem:[%s2396_s28 + $0x30] sm:$0xff] }
 0x304   : > { %v2109_v26 = vpop.eup %2108  ;;  %2134 = vlog2.f32 %v1122_v53 }
 0x305   : > { %v2111_v17 = vpop.eup %2110  ;;  %v1131_v23 = vmul.f32 0.6931472, %v2109_v26  ;;  %2136 = vlog2.f32 %v1125_v0 }
 0x306   : > { %v2113_v46 = vpop.eup %2112  ;;  %v1127_v3 = vmul.f32 0.6931472, %v2111_v17  ;;  %2138 = vlog2.f32 %v1124_v10  ;;  %v2943_v10 = vld [vmem:[%s2396_s28 + $0x48] sm:$0xff] }
 0x307   : > { %v2115_v27 = vpop.eup %2114  ;;  %v1160_v45 = vadd.f32 %v1131_v23, %v1096_v2  ;;  %v1133_v44 = vmul.f32 0.6931472, %v2113_v46  ;;  %v1108_v2 = vld [vmem:[#allocation2 + $0x70] sm:$0xff]  ;;  %v2901_v46 = vld [vmem:[%s2396_s28 + $0x28] sm:$0xff] }
 0x308   : > { %v2117_v63 = vpop.eup %2116  ;;  %v1158_v54 = vadd.f32 %v1127_v3, %v1094_v35  ;;  %v1129_v48 = vmul.f32 0.6931472, %v2115_v27  ;;  %v2898_v35 = vld [vmem:[%s2396_s28 + $0x20] sm:$0xff]  ;;  %v2913_v27 = vld [vmem:[%s2396_s28 + $0x38] sm:$0xff]  ;;  %v1217_v53 = vunpack.c.h.bf16 %v2901_v46 }
 0x309   : > { %v2119_v62 = vpop.eup %2118  ;;  %1282 = vperm.xlu1 %2107, %v1160_v45   ;;  %v1161_v5 = vadd.f32 %v1133_v44, %v1097_v39  ;;  %v1137_v8 = vmul.f32 0.6931472, %v2117_v63  ;;  %v2904_v3 = vld [vmem:[%s2396_s28] sm:$0xff]  ;;  %v2907_v39 = vld [vmem:[%s2396_s28 + $0x8] sm:$0xff]  ;;  %v1214_v45 = vunpack.c.l.bf16 %v2898_v35  ;;  %v1215_v44 = vunpack.c.h.bf16 %v2898_v35  ;;  %v2920_v63 = vld [vmem:[%s2396_s28 + $0x10] sm:$0xff] }
 0x30a   : > { %v2121_v19 = vpop.eup %2120  ;;  %1272 = vperm.xlu0 %2106, %v1158_v54   ;;  %v1159_v41 = vadd.f32 %v1129_v48, %v1095_v36  ;;  %v1135_v9 = vmul.f32 0.6931472, %v2119_v62  ;;  %v1216_v36 = vunpack.c.l.bf16 %v2901_v46  ;;  %v2923_v54 = vld [vmem:[%s2396_s28 + $0x18] sm:$0xff]  ;;  %v1206_v48 = vunpack.c.l.bf16 %v2904_v3 }
 0x30b   : > { %v2123_v12 = vpop.eup %2122  ;;  %v1163_v7 = vadd.f32 %v1137_v8, %v1099_v43  ;;  %v1141_v15 = vmul.f32 0.6931472, %v2121_v19  ;;  %v1207_v62 = vunpack.c.h.bf16 %v2904_v3  ;;  %v1209_v8 = vunpack.c.h.bf16 %v2907_v39  ;;  %v2930_v19 = vld [vmem:[%s2396_s28 + $0x50] sm:$0xff] }
 0x30c   : > { %v2125_v59 = vpop.eup %2124  ;;  %v1162_v1 = vadd.f32 %v1135_v9, %v1098_v6  ;;  %v1139_v22 = vmul.f32 0.6931472, %v2123_v12  ;;  %v1218_v43 = vunpack.c.l.bf16 %v2910_v51  ;;  %v1219_v9 = vunpack.c.h.bf16 %v2910_v51  ;;  %v2940_v6 = vld [vmem:[%s2396_s28 + $0x40] sm:$0xff] }
 0x30d   : > { %1287 = vperm.xlu1 %2107, %v1161_v5   ;;  %v2127_v38 = vpop.eup %2126  ;;  %v1165_v50 = vadd.f32 %v1141_v15, %v1101_v21  ;;  %v1145_v55 = vmul.f32 0.6931472, %v2125_v59  ;;  %v1208_v5 = vunpack.c.l.bf16 %v2907_v39  ;;  %v1220_v0 = vunpack.c.l.bf16 %v2913_v27  ;;  %v2950_v21 = vld [vmem:[%s2396_s28 + $0x70] sm:$0xff]  ;;  %v3001_v39 = vld [vmem:[%s2396_s28 + $0xb8] sm:$0xff] }
 0x30e   : > { %1277 = vperm.xlu0 %2106, %v1159_v41   ;;  %v2129_v47 = vpop.eup %2128  ;;  %v1164_v24 = vadd.f32 %v1139_v22, %v1100_v40  ;;  %v1143_v60 = vmul.f32 0.6931472, %v2127_v38  ;;  %v2933_v41 = vld [vmem:[%s2396_s28 + $0x58] sm:$0xff]  ;;  %v1221_v12 = vunpack.c.h.bf16 %v2913_v27  ;;  %v1211_v15 = vunpack.c.h.bf16 %v2920_v63 }
 0x30f   : > { %v2131_v13 = vpop.eup %2130  ;;  %v1167_v58 = vadd.f32 %v1145_v55, %v1103_v52  ;;  %v1149_v11 = vmul.f32 0.6931472, %v2129_v47  ;;  %v1212_v59 = vunpack.c.l.bf16 %v2923_v54  ;;  %v2953_v22 = vld [vmem:[%s2396_s28 + $0x78] sm:$0xff]  ;;  %v1226_v38 = vunpack.c.l.bf16 %v2930_v19  ;;  %v2960_v47 = vld [vmem:[%s2396_s28 + $0x60] sm:$0xff] }
 0x310   : > { %v2133_v49 = vpop.eup %2132  ;;  %v1166_v56 = vadd.f32 %v1143_v60, %v1102_v16  ;;  %v1147_v31 = vmul.f32 0.6931472, %v2131_v13  ;;  %v1227_v40 = vunpack.c.h.bf16 %v2930_v19  ;;  %v1229_v55 = vunpack.c.h.bf16 %v2933_v41 }
 0x311   : > { %1297 = vperm.xlu1 %2107, %v1163_v7   ;;  %v2135_v32 = vpop.eup %2134  ;;  %v1169_v57 = vadd.f32 %v1149_v11, %v1105_v30  ;;  %v1153_v28 = vmul.f32 0.6931472, %v2133_v49  ;;  %v1210_v7 = vunpack.c.l.bf16 %v2920_v63  ;;  %v1222_v52 = vunpack.c.l.bf16 %v2940_v6  ;;  %v2973_v11 = vld [vmem:[%s2396_s28 + $0x98] sm:$0xff] }
 0x312   : > { %1292 = vperm.xlu0 %2106, %v1162_v1   ;;  %v2137_v20 = vpop.eup %2136  ;;  %v1168_v29 = vadd.f32 %v1147_v31, %v1104_v34  ;;  %v1151_v61 = vmul.f32 0.6931472, %v2135_v32  ;;  %v1213_v1 = vunpack.c.h.bf16 %v2923_v54  ;;  %v1223_v60 = vunpack.c.h.bf16 %v2940_v6  ;;  %v2980_v32 = vld [vmem:[%s2396_s28 + $0x80] sm:$0xff]  ;;  %v2983_v34 = vld [vmem:[%s2396_s28 + $0x88] sm:$0xff] }
 0x313   : > { %v2139_v33 = vpop.eup %2138  ;;  %v1171_v42 = vadd.f32 %v1153_v28, %v1107_v37  ;;  %v1157_v25 = vmul.f32 0.6931472, %v2137_v20  ;;  %v1224_v13 = vunpack.c.l.bf16 %v2943_v10  ;;  %v1225_v16 = vunpack.c.h.bf16 %v2943_v10 }
 0x314   : > { %v1170_v14 = vadd.f32 %v1151_v61, %v1106_v4  ;;  %v1155_v26 = vmul.f32 0.6931472, %v2139_v33  ;;  %v1234_v49 = vunpack.c.l.bf16 %v2950_v21  ;;  %v1236_v30 = vunpack.c.l.bf16 %v2953_v22 }
 0x315   : > { %1307 = vperm.xlu1 %2107, %v1165_v50   ;;  %v1173_v17 = vadd.f32 %v1157_v25, %v1109_v18  ;;  %v1228_v50 = vunpack.c.l.bf16 %v2933_v41  ;;  %v1237_v31 = vunpack.c.h.bf16 %v2953_v22  ;;  %v1231_v28 = vunpack.c.h.bf16 %v2960_v47 }
 0x316   : > { %1302 = vperm.xlu0 %2106, %v1164_v24   ;;  %v1172_v23 = vadd.f32 %v1155_v26, %v1108_v2  ;;  %v2963_v24 = vld [vmem:[%s2396_s28 + $0x68] sm:$0xff]  ;;  %v2998_v2 = vld [vmem:[%s2396_s28 + $0xb0] sm:$0xff]  ;;  %v1253_v37 = vunpack.c.h.bf16 %v3001_v39 }
 0x317   : > { %v1232_v20 = vunpack.c.l.bf16 %v2963_v24  ;;  %v1250_v26 = vunpack.c.l.bf16 %v2998_v2 }
 0x319   : > { %1317 = vperm.xlu1 %2107, %v1167_v58   ;;  %v2970_v58 = vld [vmem:[%s2396_s28 + $0x90] sm:$0xff] }
 0x31a   : > { %1312 = vperm.xlu0 %2106, %v1166_v56   ;;  %v1235_v56 = vunpack.c.h.bf16 %v2950_v21 }
 0x31d   : > { %1327 = vperm.xlu1 %2107, %v1169_v57   ;;  %v1230_v57 = vunpack.c.l.bf16 %v2960_v47 }
 0x31e   : > { %1322 = vperm.xlu0 %2106, %v1168_v29   ;;  %v1233_v29 = vunpack.c.h.bf16 %v2963_v24  ;;  %v3312_v24 = vunpack.c.l.bf16 %v2970_v58 }
 0x321   : > { %1337 = vperm.xlu1 %2107, %v1171_v42  }
 0x322   : > { %1332 = vperm.xlu0 %2106, %v1170_v14  }
 0x325   : > { %1347 = vperm.xlu1 %2107, %v1173_v17  }
 0x326   : > { %1342 = vperm.xlu0 %2106, %v1172_v23  }
 0x384   : > { %v1283_v42 = vpop.permute.xlu1 %1282 }
 0x385   : > { %v1358_v17 = vsub.f32 %v1214_v45, %v1283_v42  ;;  %v1359_v23 = vsub.f32 %v1215_v44, %v1283_v42  ;;  %v1360_v35 = vsub.f32 %v1216_v36, %v1283_v42  ;;  %v1361_v46 = vsub.f32 %v1217_v53, %v1283_v42  ;;  %v1273_v3 = vpop.permute.xlu0 %1272 }
 0x386   : > { %v1350_v4 = vsub.f32 %v1206_v48, %v1273_v3  ;;  %v1351_v25 = vsub.f32 %v1207_v62, %v1273_v3  ;;  %v1352_v33 = vsub.f32 %v1208_v5, %v1273_v3  ;;  %v1353_v14 = vsub.f32 %v1209_v8, %v1273_v3  ;;  %v3008_v48 = vld [vmem:[%s2396_s28 + $0xa0] sm:$0xff]  ;;  %v3051_v3 = vld [vmem:[%s2396_s28 + $0xd8] sm:$0xff] }
 0x387   : > { %v1867_v61 = vpack.c.bf16 %v1359_v23, %v1358_v17  ;;  %v1868_v18 = vpack.c.bf16 %v1361_v46, %v1360_v35  ;;  %v1251_v45 = vunpack.c.h.bf16 %v2998_v2  ;;  %v1252_v42 = vunpack.c.l.bf16 %v3001_v39 }
 0x388   : > { %v1863_v44 = vpack.c.bf16 %v1351_v25, %v1350_v4  ;;  %v1864_v36 = vpack.c.bf16 %v1353_v14, %v1352_v33  ;;  %v1288_v53 = vpop.permute.xlu1 %1287  ;;  %v3021_v25 = vld [vmem:[%s2396_s28 + $0xa8] sm:$0xff]  ;;  %v1247_v14 = vunpack.c.h.bf16 %v3008_v48  ;;  %v1260_v6 = vunpack.c.l.bf16 %v3051_v3 }
 0x389   : > { %1610 = vst [vmem:[%s2396_s28 + $0x20] sm:$0xff] %v1867_v61  ;;  %1611 = vst [vmem:[%s2396_s28 + $0x28] sm:$0xff] %v1868_v18  ;;  %v1362_v62 = vsub.f32 %v1218_v43, %v1288_v53  ;;  %v1363_v5 = vsub.f32 %v1219_v9, %v1288_v53  ;;  %v1364_v8 = vsub.f32 %v1220_v0, %v1288_v53  ;;  %v1278_v4 = vpop.permute.xlu0 %1277  ;;  %v1246_v61 = vunpack.c.l.bf16 %v3008_v48 }
 0x38a   : > { %v1365_v33 = vsub.f32 %v1221_v12, %v1288_v53  ;;  %1606 = vst [vmem:[%s2396_s28] sm:$0xff] %v1863_v44  ;;  %1607 = vst [vmem:[%s2396_s28 + $0x8] sm:$0xff] %v1864_v36  ;;  %v1354_v43 = vsub.f32 %v1210_v7, %v1278_v4  ;;  %v1355_v51 = vsub.f32 %v1211_v15, %v1278_v4  ;;  %v1248_v63 = vunpack.c.l.bf16 %v3021_v25 }
 0x38b   : > { %v1356_v9 = vsub.f32 %v1212_v59, %v1278_v4  ;;  %v1357_v27 = vsub.f32 %v1213_v1, %v1278_v4  ;;  %v1869_v0 = vpack.c.bf16 %v1363_v5, %v1362_v62  ;;  %v1249_v15 = vunpack.c.h.bf16 %v3021_v25  ;;  %v3038_v59 = vld [vmem:[%s2396_s28 + $0xd0] sm:$0xff]  ;;  %v3081_v4 = vld [vmem:[%s2396_s28 + $0xc8] sm:$0xff] }
 0x38c   : > { %v1870_v12 = vpack.c.bf16 %v1365_v33, %v1364_v8  ;;  %v1865_v18 = vpack.c.bf16 %v1355_v51, %v1354_v43  ;;  %v1298_v17 = vpop.permute.xlu1 %1297  ;;  %v1258_v44 = vunpack.c.l.bf16 %v3038_v59  ;;  %v1259_v36 = vunpack.c.h.bf16 %v3038_v59 }
 0x38d   : > { %v1866_v7 = vpack.c.bf16 %v1357_v27, %v1356_v9  ;;  %1612 = vst [vmem:[%s2396_s28 + $0x30] sm:$0xff] %v1869_v0  ;;  %v1370_v54 = vsub.f32 %v1226_v38, %v1298_v17  ;;  %v1371_v1 = vsub.f32 %v1227_v40, %v1298_v17  ;;  %v1372_v23 = vsub.f32 %v1228_v50, %v1298_v17  ;;  %v1293_v46 = vpop.permute.xlu0 %1292 }
 0x38e   : > { %1613 = vst [vmem:[%s2396_s28 + $0x38] sm:$0xff] %v1870_v12  ;;  %v1373_v35 = vsub.f32 %v1229_v55, %v1298_v17  ;;  %1608 = vst [vmem:[%s2396_s28 + $0x10] sm:$0xff] %v1865_v18  ;;  %v1366_v38 = vsub.f32 %v1222_v52, %v1293_v46  ;;  %v1367_v19 = vsub.f32 %v1223_v60, %v1293_v46  ;;  %v1261_v60 = vunpack.c.h.bf16 %v3051_v3 }
 0x38f   : > { %1609 = vst [vmem:[%s2396_s28 + $0x18] sm:$0xff] %v1866_v7  ;;  %v1368_v40 = vsub.f32 %v1224_v13, %v1293_v46  ;;  %v1369_v41 = vsub.f32 %v1225_v16, %v1293_v46  ;;  %v1873_v50 = vpack.c.bf16 %v1371_v1, %v1370_v54  ;;  %v3068_v13 = vld [vmem:[%s2396_s28 + $0xc0] sm:$0xff]  ;;  %v1256_v47 = vunpack.c.l.bf16 %v3081_v4 }
 0x390   : > { %v1874_v55 = vpack.c.bf16 %v1373_v35, %v1372_v23  ;;  %v1871_v53 = vpack.c.bf16 %v1367_v19, %v1366_v38  ;;  %v1308_v62 = vpop.permute.xlu1 %1307  ;;  %v1254_v43 = vunpack.c.l.bf16 %v3068_v13  ;;  %v1255_v51 = vunpack.c.h.bf16 %v3068_v13  ;;  %v3111_v23 = vld [vmem:[%s2396_s28 + $0xf8] sm:$0xff] }
 0x391   : > { %v1872_v52 = vpack.c.bf16 %v1369_v41, %v1368_v40  ;;  %1616 = vst [vmem:[%s2396_s28 + $0x50] sm:$0xff] %v1873_v50  ;;  %v1378_v10 = vsub.f32 %v1234_v49, %v1308_v62  ;;  %v1379_v16 = vsub.f32 %v1235_v56, %v1308_v62  ;;  %v1380_v5 = vsub.f32 %v1236_v30, %v1308_v62  ;;  %v1303_v33 = vpop.permute.xlu0 %1302 }
 0x392   : > { %1617 = vst [vmem:[%s2396_s28 + $0x58] sm:$0xff] %v1874_v55  ;;  %v1381_v8 = vsub.f32 %v1237_v31, %v1308_v62  ;;  %1614 = vst [vmem:[%s2396_s28 + $0x40] sm:$0xff] %v1871_v53  ;;  %v1374_v49 = vsub.f32 %v1230_v57, %v1303_v33  ;;  %v1375_v21 = vsub.f32 %v1231_v28, %v1303_v33  ;;  %v1257_v28 = vunpack.c.h.bf16 %v3081_v4 }
 0x393   : > { %1615 = vst [vmem:[%s2396_s28 + $0x48] sm:$0xff] %v1872_v52  ;;  %v1376_v56 = vsub.f32 %v1232_v20, %v1303_v33  ;;  %v1377_v22 = vsub.f32 %v1233_v29, %v1303_v33  ;;  %v1877_v30 = vpack.c.bf16 %v1379_v16, %v1378_v10  ;;  %v3098_v20 = vld [vmem:[%s2396_s28 + $0xf0] sm:$0xff]  ;;  %v3313_v0 = vunpack.c.h.bf16 %v2970_v58 }
 0x394   : > { %v1878_v31 = vpack.c.bf16 %v1381_v8, %v1380_v5  ;;  %v1875_v9 = vpack.c.bf16 %v1375_v21, %v1374_v49  ;;  %v1318_v27 = vpop.permute.xlu1 %1317  ;;  %v3314_v18 = vunpack.c.l.bf16 %v2973_v11  ;;  %v3315_v17 = vunpack.c.h.bf16 %v2973_v11  ;;  %v1202_v8 = vld [vmem:[%s2396_s28 + $0xe0] sm:$0xff] }
 0x395   : > { %v1876_v57 = vpack.c.bf16 %v1377_v22, %v1376_v56  ;;  %1620 = vst [vmem:[%s2396_s28 + $0x70] sm:$0xff] %v1877_v30  ;;  %v1386_v29 = vsub.f32 %v3312_v24, %v1318_v27  ;;  %v1387_v12 = vsub.f32 %v3313_v0, %v1318_v27  ;;  %v1313_v1 = vpop.permute.xlu0 %1312  ;;  %v3316_v35 = vunpack.c.l.bf16 %v2980_v32  ;;  %v1203_v56 = vld [vmem:[%s2396_s28 + $0xe8] sm:$0xff] }
 0x396   : > { %1621 = vst [vmem:[%s2396_s28 + $0x78] sm:$0xff] %v1878_v31  ;;  %v1388_v7 = vsub.f32 %v3314_v18, %v1318_v27  ;;  %v1389_v54 = vsub.f32 %v3315_v17, %v1318_v27  ;;  %1618 = vst [vmem:[%s2396_s28 + $0x60] sm:$0xff] %v1875_v9  ;;  %v3317_v58 = vunpack.c.h.bf16 %v2980_v32  ;;  %v3318_v19 = vunpack.c.l.bf16 %v2983_v34 }
 0x397   : > { %1619 = vst [vmem:[%s2396_s28 + $0x68] sm:$0xff] %v1876_v57  ;;  %v1382_v46 = vsub.f32 %v3316_v35, %v1313_v1  ;;  %v3319_v11 = vunpack.c.h.bf16 %v2983_v34  ;;  %v1881_v50 = vpack.c.bf16 %v1387_v12, %v1386_v29  ;;  %v1266_v53 = vunpack.c.l.bf16 %v3098_v20 }
 0x398   : > { %v1383_v38 = vsub.f32 %v3317_v58, %v1313_v1  ;;  %v1384_v40 = vsub.f32 %v3318_v19, %v1313_v1  ;;  %v1882_v55 = vpack.c.bf16 %v1389_v54, %v1388_v7  ;;  %v1267_v52 = vunpack.c.h.bf16 %v3098_v20  ;;  %v1328_v16 = vpop.permute.xlu1 %1327 }
 0x399   : > { %v1385_v41 = vsub.f32 %v3319_v11, %v1313_v1  ;;  %v1268_v32 = vunpack.c.l.bf16 %v3111_v23  ;;  %v1269_v5 = vunpack.c.h.bf16 %v3111_v23  ;;  %1624 = vst [vmem:[%s2396_s28 + $0x90] sm:$0xff] %v1881_v50  ;;  %v1394_v34 = vsub.f32 %v1250_v26, %v1328_v16  ;;  %v1323_v21 = vpop.permute.xlu0 %1322 }
 0x39a   : > { %v1879_v62 = vpack.c.bf16 %v1383_v38, %v1382_v46  ;;  %1625 = vst [vmem:[%s2396_s28 + $0x98] sm:$0xff] %v1882_v55  ;;  %v1395_v33 = vsub.f32 %v1251_v45, %v1328_v16  ;;  %v1396_v4 = vsub.f32 %v1252_v42, %v1328_v16  ;;  %v1397_v49 = vsub.f32 %v1253_v37, %v1328_v16 }
 0x39b   : > { %v1880_v10 = vpack.c.bf16 %v1385_v41, %v1384_v40  ;;  %v1390_v22 = vsub.f32 %v1246_v61, %v1323_v21  ;;  %v1391_v26 = vsub.f32 %v1247_v14, %v1323_v21  ;;  %v1392_v2 = vsub.f32 %v1248_v63, %v1323_v21 }
 0x39c   : > { %1622 = vst [vmem:[%s2396_s28 + $0x80] sm:$0xff] %v1879_v62  ;;  %v1393_v45 = vsub.f32 %v1249_v15, %v1323_v21  ;;  %v1885_v39 = vpack.c.bf16 %v1395_v33, %v1394_v34  ;;  %v1886_v37 = vpack.c.bf16 %v1397_v49, %v1396_v4  ;;  %v1262_v42 = vunpack.c.l.bf16 %v1202_v8  ;;  %v1338_v57 = vpop.permute.xlu1 %1337 }
 0x39d   : > { %1623 = vst [vmem:[%s2396_s28 + $0x88] sm:$0xff] %v1880_v10  ;;  %v1263_v30 = vunpack.c.h.bf16 %v1202_v8  ;;  %v1883_v31 = vpack.c.bf16 %v1391_v26, %v1390_v22  ;;  %v1264_v27 = vunpack.c.l.bf16 %v1203_v56  ;;  %v1265_v61 = vunpack.c.h.bf16 %v1203_v56  ;;  %v1333_v15 = vpop.permute.xlu0 %1332 }
 0x39e   : > { %v1884_v9 = vpack.c.bf16 %v1393_v45, %v1392_v2  ;;  %1628 = vst [vmem:[%s2396_s28 + $0xb0] sm:$0xff] %v1885_v39  ;;  %1629 = vst [vmem:[%s2396_s28 + $0xb8] sm:$0xff] %v1886_v37  ;;  %v1402_v48 = vsub.f32 %v1258_v44, %v1338_v57  ;;  %v1403_v25 = vsub.f32 %v1259_v36, %v1338_v57 }
 0x39f   : > { %v1404_v14 = vsub.f32 %v1260_v6, %v1338_v57  ;;  %v1405_v63 = vsub.f32 %v1261_v60, %v1338_v57  ;;  %1626 = vst [vmem:[%s2396_s28 + $0xa0] sm:$0xff] %v1883_v31  ;;  %v1398_v20 = vsub.f32 %v1254_v43, %v1333_v15  ;;  %v1399_v44 = vsub.f32 %v1255_v51, %v1333_v15 }
 0x3a0   : > { %1627 = vst [vmem:[%s2396_s28 + $0xa8] sm:$0xff] %v1884_v9  ;;  %v1400_v59 = vsub.f32 %v1256_v47, %v1333_v15  ;;  %v1401_v36 = vsub.f32 %v1257_v28, %v1333_v15  ;;  %v1889_v24 = vpack.c.bf16 %v1403_v25, %v1402_v48  ;;  %v1348_v12 = vpop.permute.xlu1 %1347 }
 0x3a1   : > { %v1890_v29 = vpack.c.bf16 %v1405_v63, %v1404_v14  ;;  %v1887_v0 = vpack.c.bf16 %v1399_v44, %v1398_v20  ;;  %v1410_v3 = vsub.f32 %v1266_v53, %v1348_v12  ;;  %v1411_v60 = vsub.f32 %v1267_v52, %v1348_v12  ;;  %v1343_v18 = vpop.permute.xlu0 %1342 }
 0x3a2   : > { %v1888_v6 = vpack.c.bf16 %v1401_v36, %v1400_v59  ;;  %1632 = vst [vmem:[%s2396_s28 + $0xd0] sm:$0xff] %v1889_v24  ;;  %v1412_v43 = vsub.f32 %v1268_v32, %v1348_v12  ;;  %v1413_v13 = vsub.f32 %v1269_v5, %v1348_v12  ;;  %v1406_v51 = vsub.f32 %v1262_v42, %v1343_v18 }
 0x3a3   : > { %1633 = vst [vmem:[%s2396_s28 + $0xd8] sm:$0xff] %v1890_v29  ;;  %1630 = vst [vmem:[%s2396_s28 + $0xc0] sm:$0xff] %v1887_v0  ;;  %v1407_v47 = vsub.f32 %v1263_v30, %v1343_v18  ;;  %v1408_v28 = vsub.f32 %v1264_v27, %v1343_v18  ;;  %v1409_v7 = vsub.f32 %v1265_v61, %v1343_v18 }
 0x3a4   : > { %1631 = vst [vmem:[%s2396_s28 + $0xc8] sm:$0xff] %v1888_v6  ;;  %v1893_v17 = vpack.c.bf16 %v1411_v60, %v1410_v3  ;;  %v1894_v54 = vpack.c.bf16 %v1413_v13, %v1412_v43 }
 0x3a5   : > { %v1891_v1 = vpack.c.bf16 %v1407_v47, %v1406_v51  ;;  %v1892_v23 = vpack.c.bf16 %v1409_v7, %v1408_v28 }
 0x3a6   : > { %1636 = vst [vmem:[%s2396_s28 + $0xf0] sm:$0xff] %v1893_v17  ;;  %1637 = vst [vmem:[%s2396_s28 + $0xf8] sm:$0xff] %v1894_v54 }
 0x3a7   : > { %1634 = vst [vmem:[%s2396_s28 + $0xe0] sm:$0xff] %v1891_v1  ;;  %1635 = vst [vmem:[%s2396_s28 + $0xe8] sm:$0xff] %v1892_v23 }
 0x3a8 PF: > { %s1896_s17 = sshll.u32 %s2236_s18, 12  ;;  %s1653_s26 = sshll.u32 %s2396_s28, 4  ;;  %s3180_s26 = int_to_ptr.vmem [resolvable:$true] %s1653_s26 }
 0x3a9   : > { %s3177_s23 = scalar_lea.hbm %s3244_s3, %s1896_s17  ;;  %s3320_s15 = sand.u32 1, %s2216_s13  }
 0x3aa   : > { %s3184_s27 = scalar_lea.sflag [#allocation6], %s3320_s15  ;;  %s2140_s1 = scalar_lea.vmem %s3180_s26, 4096 }
 0x3ab   : > { %p2141_p7 = scmp.ne.s32.totalorder %s3180_s26, %s2140_s1  ;;  %s2254_s18 = smov [#allocation5]  }
 0x3ac   : > { %s2144_s29 = sshll.u32 %s2254_s18, 4  ;;  %s2145_s29 = int_to_ptr.vmem [resolvable:$false] %s2144_s29 }
 0x3ad   : > { %p2142_p8 = pnand %p2141_p7, %p2356_p10  ;;  %s2146_s4 = scalar_lea.vmem %s2145_s29, 8192 }
 0x3ae   : > { %p2147_p11 = scmp.lt.s32.totalorder %s3180_s26, %s2145_s29  ;;  %p2148_p13 = scmp.lt.s32.totalorder %s2146_s4, %s2140_s1 }
 0x3af   : > { %p2143_p9 = pneg %p2142_p8 }
 0x3b0   : > { %p2149_p0 = por %p2148_p13, %p2147_p11 }
 0x3b2   : > { %p2150_p1 = pnand %p2149_p0, %p2143_p9 }
 0x3b4   : > { %2153 = shalt.err (!%p2150_p1)
}
 0x3b5   : > { %s2154_s28 = scalar_lea.hbm %s3177_s23, 4096  ;;  %s2158_s9 = scalar_lea.hbm %s3244_s3, 8192 }
 0x3b6   : > { %p2155_p2 = scmp.ne.s32.totalorder %s3177_s23, %s2154_s28  ;;  %p2159_p5 = scmp.lt.s32.totalorder %s3177_s23, %s3244_s3 }
 0x3b7   : > { %p2160_p6 = scmp.lt.s32.totalorder %s2158_s9, %s2154_s28 }
 0x3b8   : > { %p2156_p3 = pnand %p2155_p2, %p2356_p10 }
 0x3b9   : > { %p2161_p7 = por %p2160_p6, %p2159_p5 }
 0x3ba   : > { %p2157_p4 = pneg %p2156_p3 }
 0x3bc   : > { %p2162_p8 = pnand %p2161_p7, %p2157_p4 }
 0x3be   : > { %2165 = shalt.err (!%p2162_p8)
}
 0x3bf   : > { %s2255_s22 = smov 256   ;;  %s2256_s15 = smov 16  }
 0x3c0   : > { %1901 = dma.vmem_to_hbm [thread:$0]  (%p2356_p10), %s3180_s26, 4096, %s3177_s23, %s3184_s27, %s2255_s22, %s2255_s22, %s2256_s15  }
 0x3c1 PF: > { %p1907_p9 = scmp.ge.s32.totalorder %s2248_s21, 2  ;;  %s1668_s1 = sand.u32 1, %s2212_s12  }
 0x3c2   : > { %s1669_s18 = scalar_lea.sflag [#allocation6], %s1668_s1 }
 0x3c3   : > { %p1904_p11 = pnand %p1907_p9, %p2363_p12 }
 0x3c5   : > { %p1905_p13 = pneg %p1904_p11 }
 0x3c7   : > { %2207 = dma.done.wait (%p1905_p13), %s1669_s18, 4096  }
 0x3c8   : > { %2209 = vsyncadd (%p1905_p13), %s1669_s18, 4294963200  ;;  %s16_s21 = sadd.s32 1, %s2248_s21   ;;  %s3321_s12 = smov %s2216_s13 }
 0x3c9   : > { %p13_p0 = scmp.ge.s32.totalorder %s16_s21, 6   ;;  %s3322_s13 = smov %s2220_s14 }
 0x3ca   : > { %s3323_s14 = smov %s2361_s6  ;;  %s3324_s15 = smov %s2228_s16 }
 0x3cb   : > { %s3325_s16 = smov %s2350_s30  ;;  %s3326_s17 = smov %s2240_s19 }
 0x3cc   : > { %s3327_s18 = smov %s2244_s20  ;;  %s3328_s19 = smov %s3331_s24 }
 0x3cd   : > { %s3329_s20 = smov %s3335_s25  ;;  %15 = sbr.rel (!%p13_p0) target bundleno = 8 (0x8), region = 125 }
 0x3d2   :  { %1674 = vsyncpa [#allocation6], 1 }
 0x3d3   :  { %1676 = vsyncpa [#allocation6 + $0x1], 1 }

</bundles_post_ra>
